<compile_context>
chip_gen: v5e
topology: v5e:2x2
jax: 0.10.0
libtpu: 0.0.40
codegen_flags: <defaults>
</compile_context>

<pallas_src>
import functools

import jax
import jax.numpy as jnp
from jax import lax
from jax.experimental import pallas as pl
from jax.experimental.pallas import tpu as pltpu


def _round_up(x, m):
    return (x + m - 1) // m * m


def _tpu_vmem_capacity_bytes():
    """Physical per-core VMEM; conservative 64 MiB (v7x) fallback."""
    try:
        return int(pltpu.get_tpu_info().vmem_capacity_bytes)
    except Exception:
        return 64 << 20


def _proposal_kernel(slab_ref, wconv_ref, bconv_ref, whead_ref, bhead_ref,
                     out_ref, *, tm, w):
    # slab_ref:  (TSLAB, Kd_pad)  dx-im2col rows for this tile + 2*W halo rows
    # wconv_ref: (3, Kd_pad, Chid_pad)  per-dy (3*Cin, Chid) conv matrices
    # bconv_ref: (1, Chid_pad)  f32
    # whead_ref: (Chid_pad, Cout_pad)   fused conf+reg 1x1 head (lane padded)
    # bhead_ref: (1, Cout_pad)  f32
    # out_ref:   (TM, Cout_pad)         compute_dtype
    # 3x3 conv = 3 MXU matmuls over dy-shifted windows, f32 accumulation.
    acc = jnp.dot(slab_ref[pl.ds(0, tm), :], wconv_ref[0],
                  preferred_element_type=jnp.float32)
    acc = acc + jnp.dot(slab_ref[pl.ds(w, tm), :], wconv_ref[1],
                        preferred_element_type=jnp.float32)
    acc = acc + jnp.dot(slab_ref[pl.ds(2 * w, tm), :], wconv_ref[2],
                        preferred_element_type=jnp.float32)
    # dropout (eval) = identity; bias + ReLU kept in f32 (v5e-safe epilogue).
    hidden = jnp.maximum(acc + bconv_ref[...], 0.0)
    # Fused conf+reg heads: one lane-dense matmul, unmasked stores.
    heads = jnp.dot(hidden.astype(whead_ref.dtype), whead_ref[...],
                    preferred_element_type=jnp.float32) + bhead_ref[...]
    out_ref[...] = heads.astype(out_ref.dtype)


def proposal_module_forward(feature_map_nchw, params, num_anc_boxes=9, *,
                            compute_dtype=jnp.bfloat16, tile_m=None,
                            out_layout="NCHW"):
    """Eval-mode forward of ProposalModule.

    feature_map_nchw: (N, Cin, H, W) float32
    returns (conf_scores_pred, reg_offsets_pred):
        NCHW (default): (N, A, H, W), (N, 4A, H, W)
        NHWC (out_layout="NHWC"): (N, H, W, A), (N, H, W, 4A)  (skips 2 transposes)
    """
    w_conv, b_conv, w_conf, b_conf, w_reg, b_reg = params
    N, Cin, H, W = feature_map_nchw.shape
    Chid = w_conv.shape[-1]
    A = num_anc_boxes
    Cout = 5 * A                        # fused conf (A) + reg (4A) head
    Kd = 3 * Cin                        # dx-only im2col contraction dim
    Kd_pad = _round_up(Kd, 128)         # lane-dense MXU contraction
    Chid_pad = _round_up(Chid, 128)
    Cout_pad = _round_up(Cout, 128)     # lane-dense output slab
    bpe = jnp.dtype(compute_dtype).itemsize

    # --- row-tile selection (bounded padding waste, megacore-friendly) -----
    M = H * W
    vmem_cap = _tpu_vmem_capacity_bytes()
    if tile_m is None:
        tile_m = 1024 if vmem_cap > (96 << 20) else 512   # v5e/v6e vs v7x
    n_tiles = max(1, pl.cdiv(M, tile_m))
    if N * n_tiles < 2 and M > 256:
        n_tiles = 2                     # keep both v7x TensorCores busy
    TM = min(_round_up(pl.cdiv(M, n_tiles), 128), _round_up(M, 8))
    m_tiles = pl.cdiv(M, TM)
    M_pad = m_tiles * TM
    TSLAB = _round_up(TM + 2 * W, 8)    # per-tile rows incl. the dy halo

    # --- wrapper-side im2col: 3x replication, compute_dtype end-to-end -----
    x = jnp.transpose(feature_map_nchw, (0, 2, 3, 1)).astype(compute_dtype)
    xp = jnp.pad(x, ((0, 0), (1, 1), (1, 1), (0, 0)))          # (N,H+2,W+2,C)
    taps = [xp[:, :, dx:dx + W, :] for dx in range(3)]          # dy in-kernel
    p3 = jnp.concatenate(taps, axis=-1).reshape(N, (H + 2) * W, Kd)
    rows_needed = (m_tiles - 1) * TM + TSLAB
    p3 = jnp.pad(p3, ((0, 0), (0, max(0, rows_needed - (H + 2) * W)),
                      (0, Kd_pad - Kd)))
    # Per-tile slabs: only the 2*W halo rows are duplicated (~(TM+2W)/TM, not 9x).
    slabs = jnp.stack([p3[:, t * TM:t * TM + TSLAB, :] for t in range(m_tiles)],
                      axis=1)                      # (N, m_tiles, TSLAB, Kd_pad)

    # --- weights: per-dy conv matrices + fused lane-padded conf/reg head ---
    w3 = w_conv.reshape(3, Kd, Chid)                           # (dy, dx*cin, Chid)
    w3 = jnp.pad(w3, ((0, 0), (0, Kd_pad - Kd),
                      (0, Chid_pad - Chid))).astype(compute_dtype)
    b_conv_row = jnp.pad(b_conv, (0, Chid_pad - Chid)).reshape(1, Chid_pad)
    b_conv_row = b_conv_row.astype(jnp.float32)
    w_heads = jnp.concatenate([w_conf, w_reg], axis=1)         # (Chid, 5A)
    w_heads = jnp.pad(w_heads, ((0, Chid_pad - Chid),
                                (0, Cout_pad - Cout))).astype(compute_dtype)
    b_heads = jnp.pad(jnp.concatenate([b_conf, b_reg]), (0, Cout_pad - Cout))
    b_heads = b_heads.reshape(1, Cout_pad).astype(jnp.float32)

    # --- cost estimate & explicit VMEM budget -------------------------------
    flops = 2 * N * M_pad * (3 * Kd_pad * Chid_pad + Chid_pad * Cout_pad)
    bytes_accessed = (slabs.size * bpe + w3.size * bpe + w_heads.size * bpe
                      + (b_conv_row.size + b_heads.size) * 4
                      + N * M_pad * Cout_pad * bpe)
    vmem_needed = (2 * TSLAB * Kd_pad * bpe          # slab double buffer
                   + 3 * Kd_pad * Chid_pad * bpe     # conv weights (single buf)
                   + Chid_pad * Cout_pad * bpe       # head weights (single buf)
                   + (Chid_pad + Cout_pad) * 4       # biases
                   + 2 * TM * Cout_pad * bpe         # output double buffer
                   + (4 << 20))                      # Mosaic internal headroom
    vmem_limit = int(min(max(vmem_needed, 16 << 20), vmem_cap - (16 << 20)))

    def _run(single_buffer_weights):
        invariant = ({"pipeline_mode": pl.Buffered(1)}
                     if single_buffer_weights else {})
        return pl.pallas_call(
            functools.partial(_proposal_kernel, tm=TM, w=W),
            out_shape=jax.ShapeDtypeStruct((N, M_pad, Cout_pad), compute_dtype),
            grid_spec=pltpu.PrefetchScalarGridSpec(
                num_scalar_prefetch=0,
                grid=(N, m_tiles),
                in_specs=[
                    pl.BlockSpec((None, None, TSLAB, Kd_pad),
                                 lambda b, m: (b, m, 0, 0)),
                    pl.BlockSpec((3, Kd_pad, Chid_pad),
                                 lambda b, m: (0, 0, 0), **invariant),
                    pl.BlockSpec((1, Chid_pad),
                                 lambda b, m: (0, 0), **invariant),
                    pl.BlockSpec((Chid_pad, Cout_pad),
                                 lambda b, m: (0, 0), **invariant),
                    pl.BlockSpec((1, Cout_pad),
                                 lambda b, m: (0, 0), **invariant),
                ],
                out_specs=pl.BlockSpec((None, TM, Cout_pad),
                                       lambda b, m: (b, m, 0)),
            ),
            compiler_params=pltpu.CompilerParams(
                dimension_semantics=("parallel", "parallel"),
                vmem_limit_bytes=vmem_limit),
            cost_estimate=pl.CostEstimate(flops=flops, transcendentals=0,
                                          bytes_accessed=bytes_accessed),
        )(slabs, w3, b_conv_row, w_heads, b_heads)

    try:
        out_flat = _run(True)
    except Exception:
        # pl.Buffered(1) single-buffering not supported in this environment;
        # default double-buffered weights are still correct (just more VMEM).
        out_flat = _run(False)

    # Un-pad, cast back to f32 during the slice pass, split the fused heads.
    out = out_flat[:, :M, :Cout].astype(jnp.float32).reshape(N, H, W, Cout)
    conf_nhwc, reg_nhwc = out[..., :A], out[..., A:]
    if out_layout == "NHWC":
        # Saves two full f32 HBM transpose passes when the consumer is NHWC.
        return conf_nhwc, reg_nhwc
    return (jnp.transpose(conf_nhwc, (0, 3, 1, 2)),
            jnp.transpose(reg_nhwc, (0, 3, 1, 2)))


def _reference_forward(feature_map_nchw, params, num_anc_boxes=9):
    """Pure-JAX reference (lax.conv) used to sanity-check the kernel."""
    w_conv, b_conv, w_conf, b_conf, w_reg, b_reg = params
    x_nhwc = jnp.transpose(feature_map_nchw, (0, 2, 3, 1))
    hid = lax.conv_general_dilated(
        x_nhwc, w_conv, window_strides=(1, 1), padding="SAME",
        dimension_numbers=("NHWC", "HWIO", "NHWC")) + b_conv
    hid = jnp.maximum(hid, 0.0)
    conf = jnp.einsum("nhwc,ca->nhwa", hid, w_conf) + b_conf
    reg = jnp.einsum("nhwc,ca->nhwa", hid, w_reg) + b_reg
    return (jnp.transpose(conf, (0, 3, 1, 2)),
            jnp.transpose(reg, (0, 3, 1, 2)))


def init_params(key, in_features, hidden_dim, num_anc_boxes=9):
    """Deterministic synthetic parameter init (conv HWIO, 1x1 heads (Cin,Cout))."""
    ks = jax.random.split(key, 6)
    w_conv = jax.random.normal(ks[0], (3, 3, in_features, hidden_dim),
                               jnp.float32) * 0.1
    b_conv = jax.random.normal(ks[1], (hidden_dim,), jnp.float32) * 0.1
    w_conf = jax.random.normal(ks[2], (hidden_dim, num_anc_boxes),
                               jnp.float32) * 0.1
    b_conf = jax.random.normal(ks[3], (num_anc_boxes,), jnp.float32) * 0.1
    w_reg = jax.random.normal(ks[4], (hidden_dim, num_anc_boxes * 4),
                              jnp.float32) * 0.1
    b_reg = jax.random.normal(ks[5], (num_anc_boxes * 4,), jnp.float32) * 0.1
    return (w_conv, b_conv, w_conf, b_conf, w_reg, b_reg)


if __name__ == "__main__":
    N, Cin, H, W = 2, 4, 16, 16
    hidden_dim = 32
    num_anc_boxes = 9

    key = jax.random.PRNGKey(0)
    k_x, k_p = jax.random.split(key)
    feature_map = jax.random.normal(k_x, (N, Cin, H, W), jnp.float32)
    params = init_params(k_p, Cin, hidden_dim, num_anc_boxes)

    conf_ref, reg_ref = _reference_forward(feature_map, params, num_anc_boxes)

    # f32 compute path: tight numerical check against the lax.conv reference.
    conf32, reg32 = proposal_module_forward(feature_map, params, num_anc_boxes,
                                            compute_dtype=jnp.float32)
    conf32, reg32 = jax.block_until_ready((conf32, reg32))
    assert conf32.shape == (N, num_anc_boxes, H, W)
    assert reg32.shape == (N, 4 * num_anc_boxes, H, W)
    assert jnp.allclose(conf32, conf_ref, atol=1e-4, rtol=1e-4)
    assert jnp.allclose(reg32, reg_ref, atol=1e-4, rtol=1e-4)

    # Default bf16 matmul path (f32 MXU accumulation): relaxed tolerance check.
    conf_bf, reg_bf = proposal_module_forward(feature_map, params,
                                              num_anc_boxes)
    conf_bf, reg_bf = jax.block_until_ready((conf_bf, reg_bf))
    assert conf_bf.shape == (N, num_anc_boxes, H, W)
    assert reg_bf.shape == (N, 4 * num_anc_boxes, H, W)
    assert jnp.allclose(conf_bf, conf_ref, atol=5e-2, rtol=5e-2)
    assert jnp.allclose(reg_bf, reg_ref, atol=5e-2, rtol=5e-2)

    print("KERNEL_OK")
</pallas_src>

<mosaic_0001>
module attributes {stable_mosaic.version = 11 : i64} {
  func.func @_proposal_kernel(%arg0: i32, %arg1: i32, %arg2: memref<1x1x288x128xf32, #tpu.memory_space<vmem>>, %arg3: memref<3x128x128xf32, #tpu.memory_space<vmem>>, %arg4: memref<1x128xf32, #tpu.memory_space<vmem>>, %arg5: memref<128x128xf32, #tpu.memory_space<vmem>>, %arg6: memref<1x128xf32, #tpu.memory_space<vmem>>, %arg7: memref<1x256x128xf32, #tpu.memory_space<vmem>>) attributes {dimension_semantics = [#tpu.dimension_semantics<parallel>, #tpu.dimension_semantics<parallel>], iteration_bounds = array<i64: 2, 1>, scalar_prefetch = 0 : i64, scratch_operands = 0 : i64, tpu.core_type = #tpu.core_type<tc>, window_params = [{transform_indices = @transform_0, window_bounds = array<i64: 1, 1, 288, 128>}, {pipeline_mode = #tpu.pipeline_mode<synchronous>, transform_indices = @transform_1, window_bounds = array<i64: 3, 128, 128>}, {pipeline_mode = #tpu.pipeline_mode<synchronous>, transform_indices = @transform_2, window_bounds = array<i64: 1, 128>}, {pipeline_mode = #tpu.pipeline_mode<synchronous>, transform_indices = @transform_3, window_bounds = array<i64: 128, 128>}, {pipeline_mode = #tpu.pipeline_mode<synchronous>, transform_indices = @transform_4, window_bounds = array<i64: 1, 128>}, {transform_indices = @transform_5, window_bounds = array<i64: 1, 256, 128>}]} {
    %c0 = arith.constant 0 : index
    %c0_0 = arith.constant 0 : index
    %c0_1 = arith.constant 0 : index
    %c0_2 = arith.constant 0 : index
    %0 = vector.load %arg2[%c0, %c0_0, %c0_1, %c0_2] : memref<1x1x288x128xf32, #tpu.memory_space<vmem>>, vector<1x1x256x128xf32>
    %1 = vector.shape_cast %0 : vector<1x1x256x128xf32> to vector<256x128xf32>
    %c0_3 = arith.constant 0 : index
    %c0_4 = arith.constant 0 : index
    %c0_5 = arith.constant 0 : index
    %2 = vector.load %arg3[%c0_3, %c0_4, %c0_5] : memref<3x128x128xf32, #tpu.memory_space<vmem>>, vector<1x128x128xf32>
    %3 = vector.shape_cast %2 : vector<1x128x128xf32> to vector<128x128xf32>
    %cst = arith.constant dense<0.000000e+00> : vector<256x128xf32>
    %4 = tpu.matmul %1, %3, %cst {dimension_numbers = #tpu.dot_dimension_numbers<[1], [0], [0], [1], [0, 0, 1, 1], [], []>} : vector<256x128xf32>, vector<128x128xf32>, vector<256x128xf32> -> vector<256x128xf32>
    %c0_6 = arith.constant 0 : index
    %c0_7 = arith.constant 0 : index
    %c16 = arith.constant 16 : index
    %c0_8 = arith.constant 0 : index
    %5 = vector.load %arg2[%c0_6, %c0_7, %c16, %c0_8] : memref<1x1x288x128xf32, #tpu.memory_space<vmem>>, vector<1x1x256x128xf32>
    %6 = vector.shape_cast %5 : vector<1x1x256x128xf32> to vector<256x128xf32>
    %c1 = arith.constant 1 : index
    %c0_9 = arith.constant 0 : index
    %c0_10 = arith.constant 0 : index
    %7 = vector.load %arg3[%c1, %c0_9, %c0_10] : memref<3x128x128xf32, #tpu.memory_space<vmem>>, vector<1x128x128xf32>
    %8 = vector.shape_cast %7 : vector<1x128x128xf32> to vector<128x128xf32>
    %cst_11 = arith.constant dense<0.000000e+00> : vector<256x128xf32>
    %9 = tpu.matmul %6, %8, %cst_11 {dimension_numbers = #tpu.dot_dimension_numbers<[1], [0], [0], [1], [0, 0, 1, 1], [], []>} : vector<256x128xf32>, vector<128x128xf32>, vector<256x128xf32> -> vector<256x128xf32>
    %10 = arith.addf %4, %9 : vector<256x128xf32>
    %c0_12 = arith.constant 0 : index
    %c0_13 = arith.constant 0 : index
    %c32 = arith.constant 32 : index
    %c0_14 = arith.constant 0 : index
    %11 = vector.load %arg2[%c0_12, %c0_13, %c32, %c0_14] : memref<1x1x288x128xf32, #tpu.memory_space<vmem>>, vector<1x1x256x128xf32>
    %12 = vector.shape_cast %11 : vector<1x1x256x128xf32> to vector<256x128xf32>
    %c2 = arith.constant 2 : index
    %c0_15 = arith.constant 0 : index
    %c0_16 = arith.constant 0 : index
    %13 = vector.load %arg3[%c2, %c0_15, %c0_16] : memref<3x128x128xf32, #tpu.memory_space<vmem>>, vector<1x128x128xf32>
    %14 = vector.shape_cast %13 : vector<1x128x128xf32> to vector<128x128xf32>
    %cst_17 = arith.constant dense<0.000000e+00> : vector<256x128xf32>
    %15 = tpu.matmul %12, %14, %cst_17 {dimension_numbers = #tpu.dot_dimension_numbers<[1], [0], [0], [1], [0, 0, 1, 1], [], []>} : vector<256x128xf32>, vector<128x128xf32>, vector<256x128xf32> -> vector<256x128xf32>
    %16 = arith.addf %10, %15 : vector<256x128xf32>
    %c0_18 = arith.constant 0 : index
    %c0_19 = arith.constant 0 : index
    %17 = vector.load %arg4[%c0_18, %c0_19] : memref<1x128xf32, #tpu.memory_space<vmem>>, vector<1x128xf32>
    %18 = vector.broadcast %17 : vector<1x128xf32> to vector<256x128xf32>
    %19 = arith.addf %16, %18 : vector<256x128xf32>
    %cst_20 = arith.constant 0.000000e+00 : f32
    %20 = vector.broadcast %cst_20 : f32 to vector<256x128xf32>
    %21 = arith.maximumf %19, %20 : vector<256x128xf32>
    %c0_21 = arith.constant 0 : index
    %c0_22 = arith.constant 0 : index
    %22 = vector.load %arg5[%c0_21, %c0_22] : memref<128x128xf32, #tpu.memory_space<vmem>>, vector<128x128xf32>
    %cst_23 = arith.constant dense<0.000000e+00> : vector<256x128xf32>
    %23 = tpu.matmul %21, %22, %cst_23 {dimension_numbers = #tpu.dot_dimension_numbers<[1], [0], [0], [1], [0, 0, 1, 1], [], []>} : vector<256x128xf32>, vector<128x128xf32>, vector<256x128xf32> -> vector<256x128xf32>
    %c0_24 = arith.constant 0 : index
    %c0_25 = arith.constant 0 : index
    %24 = vector.load %arg6[%c0_24, %c0_25] : memref<1x128xf32, #tpu.memory_space<vmem>>, vector<1x128xf32>
    %25 = vector.broadcast %24 : vector<1x128xf32> to vector<256x128xf32>
    %26 = arith.addf %23, %25 : vector<256x128xf32>
    %c0_26 = arith.constant 0 : index
    %c0_27 = arith.constant 0 : index
    %c0_28 = arith.constant 0 : index
    %27 = vector.load %arg7[%c0_26, %c0_27, %c0_28] : memref<1x256x128xf32, #tpu.memory_space<vmem>>, vector<1x256x128xf32>
    %28 = vector.shape_cast %27 : vector<1x256x128xf32> to vector<256x128xf32>
    %29 = vector.shape_cast %26 : vector<256x128xf32> to vector<1x256x128xf32>
    tpu.vector_store %arg7[%c0_26, %c0_27, %c0_28], %29 {strides = array<i32>} : memref<1x256x128xf32, #tpu.memory_space<vmem>>, vector<1x256x128xf32>,
    return
  }
  func.func @transform_0(%arg0: i32, %arg1: i32) -> (i32, i32, i32, i32) {
    %c0_i32 = arith.constant 0 : i32
    %c0_i32_0 = arith.constant 0 : i32
    %c0_i32_1 = arith.constant 0 : i32
    return %arg0, %arg1, %c0_i32, %c0_i32_0 : i32, i32, i32, i32
  }
  func.func @transform_1(%arg0: i32, %arg1: i32) -> (i32, i32, i32) {
    %c0_i32 = arith.constant 0 : i32
    %c0_i32_0 = arith.constant 0 : i32
    %c0_i32_1 = arith.constant 0 : i32
    %c0_i32_2 = arith.constant 0 : i32
    return %c0_i32, %c0_i32_0, %c0_i32_1 : i32, i32, i32
  }
  func.func @transform_2(%arg0: i32, %arg1: i32) -> (i32, i32) {
    %c0_i32 = arith.constant 0 : i32
    %c0_i32_0 = arith.constant 0 : i32
    %c0_i32_1 = arith.constant 0 : i32
    return %c0_i32, %c0_i32_0 : i32, i32
  }
  func.func @transform_3(%arg0: i32, %arg1: i32) -> (i32, i32) {
    %c0_i32 = arith.constant 0 : i32
    %c0_i32_0 = arith.constant 0 : i32
    %c0_i32_1 = arith.constant 0 : i32
    return %c0_i32, %c0_i32_0 : i32, i32
  }
  func.func @transform_4(%arg0: i32, %arg1: i32) -> (i32, i32) {
    %c0_i32 = arith.constant 0 : i32
    %c0_i32_0 = arith.constant 0 : i32
    %c0_i32_1 = arith.constant 0 : i32
    return %c0_i32, %c0_i32_0 : i32, i32
  }
  func.func @transform_5(%arg0: i32, %arg1: i32) -> (i32, i32, i32) {
    %c0_i32 = arith.constant 0 : i32
    %c0_i32_0 = arith.constant 0 : i32
    return %arg0, %arg1, %c0_i32 : i32, i32, i32
  }
}

module attributes {stable_mosaic.version = 11 : i64} {
  func.func @_proposal_kernel(%arg0: i32, %arg1: i32, %arg2: memref<1x1x288x128xf32, #tpu.memory_space<vmem>>, %arg3: memref<3x128x128xf32, #tpu.memory_space<vmem>>, %arg4: memref<1x128xf32, #tpu.memory_space<vmem>>, %arg5: memref<128x128xf32, #tpu.memory_space<vmem>>, %arg6: memref<1x128xf32, #tpu.memory_space<vmem>>, %arg7: memref<1x256x128xf32, #tpu.memory_space<vmem>>) attributes {dimension_semantics = [#tpu.dimension_semantics<parallel>, #tpu.dimension_semantics<parallel>], iteration_bounds = array<i64: 2, 1>, scalar_prefetch = 0 : i64, scratch_operands = 0 : i64, tpu.core_type = #tpu.core_type<tc>, window_params = [{transform_indices = @transform_0, window_bounds = array<i64: 1, 1, 288, 128>}, {pipeline_mode = #tpu.pipeline_mode<synchronous>, transform_indices = @transform_1, window_bounds = array<i64: 3, 128, 128>}, {pipeline_mode = #tpu.pipeline_mode<synchronous>, transform_indices = @transform_2, window_bounds = array<i64: 1, 128>}, {pipeline_mode = #tpu.pipeline_mode<synchronous>, transform_indices = @transform_3, window_bounds = array<i64: 128, 128>}, {pipeline_mode = #tpu.pipeline_mode<synchronous>, transform_indices = @transform_4, window_bounds = array<i64: 1, 128>}, {transform_indices = @transform_5, window_bounds = array<i64: 1, 256, 128>}]} {
    %c0 = arith.constant 0 : index
    %c0_0 = arith.constant 0 : index
    %c0_1 = arith.constant 0 : index
    %c0_2 = arith.constant 0 : index
    %0 = vector.load %arg2[%c0, %c0_0, %c0_1, %c0_2] : memref<1x1x288x128xf32, #tpu.memory_space<vmem>>, vector<1x1x256x128xf32>
    %1 = vector.shape_cast %0 : vector<1x1x256x128xf32> to vector<256x128xf32>
    %c0_3 = arith.constant 0 : index
    %c0_4 = arith.constant 0 : index
    %c0_5 = arith.constant 0 : index
    %2 = vector.load %arg3[%c0_3, %c0_4, %c0_5] : memref<3x128x128xf32, #tpu.memory_space<vmem>>, vector<1x128x128xf32>
    %3 = vector.shape_cast %2 : vector<1x128x128xf32> to vector<128x128xf32>
    %cst = arith.constant dense<0.000000e+00> : vector<256x128xf32>
    %4 = tpu.matmul %1, %3, %cst {dimension_numbers = #tpu.dot_dimension_numbers<[1], [0], [0], [1], [0, 0, 1, 1], [], []>} : vector<256x128xf32>, vector<128x128xf32>, vector<256x128xf32> -> vector<256x128xf32>
    %c0_6 = arith.constant 0 : index
    %c0_7 = arith.constant 0 : index
    %c16 = arith.constant 16 : index
    %c0_8 = arith.constant 0 : index
    %5 = vector.load %arg2[%c0_6, %c0_7, %c16, %c0_8] : memref<1x1x288x128xf32, #tpu.memory_space<vmem>>, vector<1x1x256x128xf32>
    %6 = vector.shape_cast %5 : vector<1x1x256x128xf32> to vector<256x128xf32>
    %c1 = arith.constant 1 : index
    %c0_9 = arith.constant 0 : index
    %c0_10 = arith.constant 0 : index
    %7 = vector.load %arg3[%c1, %c0_9, %c0_10] : memref<3x128x128xf32, #tpu.memory_space<vmem>>, vector<1x128x128xf32>
    %8 = vector.shape_cast %7 : vector<1x128x128xf32> to vector<128x128xf32>
    %cst_11 = arith.constant dense<0.000000e+00> : vector<256x128xf32>
    %9 = tpu.matmul %6, %8, %cst_11 {dimension_numbers = #tpu.dot_dimension_numbers<[1], [0], [0], [1], [0, 0, 1, 1], [], []>} : vector<256x128xf32>, vector<128x128xf32>, vector<256x128xf32> -> vector<256x128xf32>
    %10 = arith.addf %4, %9 : vector<256x128xf32>
    %c0_12 = arith.constant 0 : index
    %c0_13 = arith.constant 0 : index
    %c32 = arith.constant 32 : index
    %c0_14 = arith.constant 0 : index
    %11 = vector.load %arg2[%c0_12, %c0_13, %c32, %c0_14] : memref<1x1x288x128xf32, #tpu.memory_space<vmem>>, vector<1x1x256x128xf32>
    %12 = vector.shape_cast %11 : vector<1x1x256x128xf32> to vector<256x128xf32>
    %c2 = arith.constant 2 : index
    %c0_15 = arith.constant 0 : index
    %c0_16 = arith.constant 0 : index
    %13 = vector.load %arg3[%c2, %c0_15, %c0_16] : memref<3x128x128xf32, #tpu.memory_space<vmem>>, vector<1x128x128xf32>
    %14 = vector.shape_cast %13 : vector<1x128x128xf32> to vector<128x128xf32>
    %cst_17 = arith.constant dense<0.000000e+00> : vector<256x128xf32>
    %15 = tpu.matmul %12, %14, %cst_17 {dimension_numbers = #tpu.dot_dimension_numbers<[1], [0], [0], [1], [0, 0, 1, 1], [], []>} : vector<256x128xf32>, vector<128x128xf32>, vector<256x128xf32> -> vector<256x128xf32>
    %16 = arith.addf %10, %15 : vector<256x128xf32>
    %c0_18 = arith.constant 0 : index
    %c0_19 = arith.constant 0 : index
    %17 = vector.load %arg4[%c0_18, %c0_19] : memref<1x128xf32, #tpu.memory_space<vmem>>, vector<1x128xf32>
    %18 = vector.broadcast %17 : vector<1x128xf32> to vector<256x128xf32>
    %19 = arith.addf %16, %18 : vector<256x128xf32>
    %cst_20 = arith.constant 0.000000e+00 : f32
    %20 = vector.broadcast %cst_20 : f32 to vector<256x128xf32>
    %21 = arith.maximumf %19, %20 : vector<256x128xf32>
    %c0_21 = arith.constant 0 : index
    %c0_22 = arith.constant 0 : index
    %22 = vector.load %arg5[%c0_21, %c0_22] : memref<128x128xf32, #tpu.memory_space<vmem>>, vector<128x128xf32>
    %cst_23 = arith.constant dense<0.000000e+00> : vector<256x128xf32>
    %23 = tpu.matmul %21, %22, %cst_23 {dimension_numbers = #tpu.dot_dimension_numbers<[1], [0], [0], [1], [0, 0, 1, 1], [], []>} : vector<256x128xf32>, vector<128x128xf32>, vector<256x128xf32> -> vector<256x128xf32>
    %c0_24 = arith.constant 0 : index
    %c0_25 = arith.constant 0 : index
    %24 = vector.load %arg6[%c0_24, %c0_25] : memref<1x128xf32, #tpu.memory_space<vmem>>, vector<1x128xf32>
    %25 = vector.broadcast %24 : vector<1x128xf32> to vector<256x128xf32>
    %26 = arith.addf %23, %25 : vector<256x128xf32>
    %c0_26 = arith.constant 0 : index
    %c0_27 = arith.constant 0 : index
    %c0_28 = arith.constant 0 : index
    %27 = vector.load %arg7[%c0_26, %c0_27, %c0_28] : memref<1x256x128xf32, #tpu.memory_space<vmem>>, vector<1x256x128xf32>
    %28 = vector.shape_cast %27 : vector<1x256x128xf32> to vector<256x128xf32>
    %29 = vector.shape_cast %26 : vector<256x128xf32> to vector<1x256x128xf32>
    tpu.vector_store %arg7[%c0_26, %c0_27, %c0_28], %29 {strides = array<i32>} : memref<1x256x128xf32, #tpu.memory_space<vmem>>, vector<1x256x128xf32>,
    return
  }
  func.func @transform_0(%arg0: i32, %arg1: i32) -> (i32, i32, i32, i32) {
    %c0_i32 = arith.constant 0 : i32
    %c0_i32_0 = arith.constant 0 : i32
    %c0_i32_1 = arith.constant 0 : i32
    return %arg0, %arg1, %c0_i32, %c0_i32_0 : i32, i32, i32, i32
  }
  func.func @transform_1(%arg0: i32, %arg1: i32) -> (i32, i32, i32) {
    %c0_i32 = arith.constant 0 : i32
    %c0_i32_0 = arith.constant 0 : i32
    %c0_i32_1 = arith.constant 0 : i32
    %c0_i32_2 = arith.constant 0 : i32
    return %c0_i32, %c0_i32_0, %c0_i32_1 : i32, i32, i32
  }
  func.func @transform_2(%arg0: i32, %arg1: i32) -> (i32, i32) {
    %c0_i32 = arith.constant 0 : i32
    %c0_i32_0 = arith.constant 0 : i32
    %c0_i32_1 = arith.constant 0 : i32
    return %c0_i32, %c0_i32_0 : i32, i32
  }
  func.func @transform_3(%arg0: i32, %arg1: i32) -> (i32, i32) {
    %c0_i32 = arith.constant 0 : i32
    %c0_i32_0 = arith.constant 0 : i32
    %c0_i32_1 = arith.constant 0 : i32
    return %c0_i32, %c0_i32_0 : i32, i32
  }
  func.func @transform_4(%arg0: i32, %arg1: i32) -> (i32, i32) {
    %c0_i32 = arith.constant 0 : i32
    %c0_i32_0 = arith.constant 0 : i32
    %c0_i32_1 = arith.constant 0 : i32
    return %c0_i32, %c0_i32_0 : i32, i32
  }
  func.func @transform_5(%arg0: i32, %arg1: i32) -> (i32, i32, i32) {
    %c0_i32 = arith.constant 0 : i32
    %c0_i32_0 = arith.constant 0 : i32
    return %arg0, %arg1, %c0_i32 : i32, i32, i32
  }
}

</mosaic_0001>

<bundles_post_ra>
// kernel: tpu_custom_call.1
= control target key start
LH: loop header
LB: loop body
LE: loop exit
PB: predicated region body
PF: predicated region fallthrough
CT: control target
= control target key end

     0   :  { %s1767_s0 = inlined_call_operand.hbm [shape: f32[2,1,288,128], index: 0, kind: input, shape index: {}]   ;;  %s1768_s1 = inlined_call_operand.hbm [shape: f32[3,128,128], index: 1, kind: input, shape index: {}]   ;;  %s1769_s2 = inlined_call_operand.vmem [shape: f32[1,128], index: 2, kind: input, shape index: {}]   ;;  %s1770_s3 = inlined_call_operand.hbm [shape: f32[128,128], index: 3, kind: input, shape index: {}]   ;;  %s1771_s4 = inlined_call_operand.vmem [shape: f32[1,128], index: 4, kind: input, shape index: {}]   ;;  %s1772_s5 = inlined_call_operand.hbm [shape: f32[2,256,128], index: 5, kind: output, shape index: {}]  }
   0x1   :  { %1775 = sst [smem:[#allocation12_spill]] %s1768_s1 }
   0x2   :  { %1776 = sst [smem:[#allocation13_spill]] %s1770_s3 }
   0x3   :  { %10 = vsyncpa [#allocation3], 0 }
   0x4   :  { %12 = vsyncpa [#allocation3 + $0x1], 0 }
   0x5   :  { %13 = vsyncpa [#allocation6], 0 }
   0x6   :  { %14 = vsyncpa [#allocation4], 0 }
   0x7   :  { %16 = vsyncpa [#allocation4 + $0x1], 0  ;;  %s1464_s18 = smov 0   ;;  %s1466_s19 = smov 0  }
   0x8   :  { %s1468_s20 = smov 0   ;;  %s1470_s21 = smov 0  }
   0x9   :  { %s1472_s22 = smov 0   ;;  %s1474_s23 = smov 0  }
   0xa LB: > { %s1141_s24 = sadd.s32 4294967295, %s1426_s23   ;;  %s1142_s25 = sadd.s32 4294967294, %s1426_s23   ;;  %s1426_s23 = sphi %s1474_s23, %s22_s23   ;;  %s1422_s22 = sphi %s1472_s22, %s1791_s22   ;;  %s1418_s21 = sphi %s1470_s21, %s1790_s21   ;;  %s1414_s20 = sphi %s1468_s20, %s1789_s20   ;;  %s1410_s19 = sphi %s1466_s19, %s1788_s19   ;;  %s1406_s18 = sphi %s1464_s18, %s1787_s18  }
   0xb   : > { %p56_p0 = scmp.ne.s32.totalorder %s1410_s19, %s1406_s18  ;;  %p1498_p1 = scmp.eq.s32.totalorder %s1141_s24, 0 }
   0xc   : > { %p1502_p2 = scmp.eq.s32.totalorder %s1141_s24, 1  ;;  %p172_p3 = scmp.eq.s32.totalorder %s1142_s25, 1 }
   0xd   : > { %p1508_p4 = por %p1498_p1, %p56_p0  ;;  %p1143_p5 = scmp.ge.s32.totalorder %s1426_s23, 1 }
   0xe   : > { %p1513_p6 = por %p172_p3, %p56_p0  ;;  %p179_p7 = scmp.lt.s32.totalorder %s1426_s23, 3 }
   0xf   : > { %s1781_s1 = sld [smem:[#allocation12_spill]]  ;;  %s1428_s9 = smov [#allocation5]  }
  0x10   : > { %p1521_p8 = pnand %p1143_p5, %p179_p7  ;;  %s192_s10 = sshll.u32 %s1428_s9, 4  ;;  %s193_s10 = int_to_ptr.vmem [resolvable:$true] %s192_s10 }
  0x11   : > { %p1146_p11 = scmp.ge.s32.totalorder %s1426_s23, 2  ;;  %s1783_s3 = sld [smem:[#allocation13_spill]] }
  0x12   : > { %p1173_p9 = pneg %p1521_p8  ;;  %s1773_s14 = smov 128  }
  0x13   : > { %s1774_s15 = smov 8   ;;  %s1431_s16 = smov [#allocation7]  }
  0x14   : > { %p1174_p10 = pnand %p1173_p9, %p1498_p1  ;;  %s209_s17 = sshll.u32 %s1431_s16, 4  ;;  %s210_s17 = int_to_ptr.vmem [resolvable:$true] %s209_s17 }
  0x15   : > { %s190_s7 = sshll.u32 %s1781_s1, 4  ;;  %s34_s24 = sadd.s32 1, %s1422_s22  ;;  %s191_s7 = int_to_ptr.hbm [resolvable:$true] %s190_s7 }
  0x16   : > { %1176 = dma.hbm_to_vmem [thread:$0]  (!%p1174_p10), %s191_s7, 6144, %s193_s10, [#allocation6], %s1773_s14, %s1773_s14, %s1774_s15  }
  0x17   : > { %s207_s13 = sshll.u32 %s1783_s3, 4  ;;  %s43_s25 = sadd.s32 1, %s1414_s20  ;;  %s208_s13 = int_to_ptr.hbm [resolvable:$true] %s207_s13 }
  0x18   : > { %1179 = dma.hbm_to_vmem [thread:$0]  (!%p1174_p10), %s208_s13, 2048, %s210_s17, [#allocation6], %s1773_s14, %s1773_s14, %s1774_s15  }
  0x19   : > { %p36_p12 = scmp.ge.s32.totalorder %s34_s24, 2  ;;  %p50_p13 = scmp.ne.s32.totalorder %s1414_s20, %s1410_s19 }
  0x1a   : > { %p51_p0 = scmp.eq.s32.totalorder %s1426_s23, 0  ;;  %p1190_p3 = scmp.lt.s32.totalorder %s1426_s23, 2 }
  0x1b   : > { %s1793_s24 = smov (%p36_p12, %s34_s24), 0  ;;  %p1549_p7 = por %p1502_p2, %p50_p13 }
  0x1c   : > { %p52_p5 = por %p51_p0, %p50_p13  ;;  %s38_s6 = ssub.s32 %s1422_s22, %s1793_s24 }
  0x1d   : > { %s226_s7 = sand.u32 1, %s1414_s20   ;;  %p41_p9 = scmp.eq.s32.totalorder %s38_s6, 0 }
  0x1e   : > { %s1158_s9 = smul.u32 288, %s226_s7  ;;  %p1181_p10 = pnand %p1190_p3, %p52_p5 }
  0x1f   : > { %s1557_s10 = scalar_select %p41_p9, %s1414_s20, %s43_s25  }
  0x20   : > { %s1159_s11 = smul.u32 288, %s1422_s22  ;;  %s230_s12 = scalar_lea.vmem [#allocation2], %s1158_s9 }
  0x21   : > { %s240_s13 = sshll.u32 %s230_s12, 4  ;;  %s227_s15 = scalar_lea.sflag [#allocation3], %s226_s7  ;;  %s241_s13 = int_to_ptr.vmem [resolvable:$true] %s240_s13 }
  0x22   : > { %s237_s14 = scalar_lea.hbm %s1767_s0, %s1159_s11  ;;  %s1785_s1 = smov 8  }
  0x23   : > { %s238_s27 = sshll.u32 %s237_s14, 4  ;;  %s1786_s3 = smov 128   ;;  %s239_s27 = int_to_ptr.hbm [resolvable:$true] %s238_s27 }
  0x24   : > { %1183 = dma.hbm_to_vmem [thread:$0]  (!%p1181_p10), %s239_s27, 4608, %s241_s13, %s227_s15, %s1786_s3, %s1786_s3, %s1785_s1  }
  0x25   : > { %252 = sbr.rel (%p1521_p8) target bundleno = 601 (0x259), region = 40  ;;  %s1569_s25 = sand.u32 (!%p1521_p8), 1, %s1410_s19  }
  0x26   : > { %s1160_s6 = smul.u32 (!%p1521_p8), 288, %s1569_s25  ;;  %s255_s9 = scalar_lea.sflag (!%p1521_p8), [#allocation3], %s1569_s25 }
  0x28   : > { %s1573_s11 = scalar_lea.vmem (!%p1521_p8), [#allocation2], %s1160_s6 }
  0x2a   : > { %1393 = dma.done.wait (%p1508_p4), %s255_s9, 4608  }
  0x2b   : > { %1395 = vsyncadd (%p1508_p4), %s255_s9, 4294962688 }
  0x2c   : > { %1397 = dma.done.wait (%p1498_p1), [#allocation6], 8192  }
  0x2d   : > { %1399 = vsyncadd (%p1498_p1), [#allocation6], 4294959104  ;;  %v638_v0 = vld [vmem:[#allocation5 + $0x178] sm:$0xff]  ;;  %v637_v1 = vld [vmem:[#allocation5 + $0x170] sm:$0xff]  ;;  %s1151_s26 = sshll.u32 %s1569_s25, 8  ;;  %s1157_s15 = sshll.u32 %s1418_s21, 8 }
  0x2e   : > { %v363_v2 = vld [vmem:[#allocation5 + $0xf8] sm:$0xff]  ;;  %639 = vmatpush.msra.mxu2 %v638_v0  ;;  %v362_v4 = vld [vmem:[#allocation5 + $0xf0] sm:$0xff]  ;;  %v636_v5 = vld [vmem:[#allocation5 + $0x168] sm:$0xff]  ;;  %s1649_s14 = scalar_lea.vmem [#allocation8], %s1151_s26  ;;  %s1031_s13 = scalar_lea.hbm %s1772_s5, %s1157_s15 }
  0x2f   : > { %364 = vmatpush.msra.mxu0 %v363_v2  ;;  %v344_v3 = vld [vmem:[#allocation5 + $0x78] sm:$0xff]  ;;  %v343_v6 = vld [vmem:[#allocation5 + $0x70] sm:$0xff]  ;;  %v361_v7 = vld [vmem:[#allocation5 + $0xe8] sm:$0xff]  ;;  %s1032_s16 = sshll.u32 %s1649_s14, 4  ;;  %s1034_s17 = sshll.u32 %s1031_s13, 4  ;;  %s1033_s16 = int_to_ptr.vmem [resolvable:$true] %s1032_s16  ;;  %s1035_s17 = int_to_ptr.hbm [resolvable:$true] %s1034_s17 }
  0x30   : > { %477 = vmatpush.msra.mxu1 %v344_v3  ;;  %640 = vmatpush.msra.mxu2 %v637_v1  ;;  %v342_v8 = vld [vmem:[#allocation5 + $0x68] sm:$0xff]  ;;  %v635_v9 = vld [vmem:[#allocation5 + $0x160] sm:$0xff]  ;;  %v634_v12 = vld [vmem:[#allocation5 + $0x158] sm:$0xff]  ;;  %s1018_s27 = scalar_lea.sflag [#allocation4], %s1569_s25  ;;  %s1354_s6 = sshra.s32 %s1035_s17, 4  ;;  %s1355_s6 = int_to_ptr.hbm [resolvable:$true] %s1354_s6 }
  0x31   : > { %365 = vmatpush.msra.mxu0 %v362_v4  ;;  %v360_v10 = vld [vmem:[#allocation5 + $0xe0] sm:$0xff]  ;;  %v359_v13 = vld [vmem:[#allocation5 + $0xd8] sm:$0xff]  ;;  %v633_v15 = vld [vmem:[#allocation5 + $0x150] sm:$0xff]  ;;  %s1356_s21 = scalar_lea.hbm %s1355_s6, 256  ;;  %s1360_s1 = scalar_lea.hbm %s1772_s5, 512 }
  0x32   : > { %478 = vmatpush.msra.mxu1 %v343_v6  ;;  %641 = vmatpush.msra.mxu2 %v636_v5  ;;  %v341_v11 = vld [vmem:[#allocation5 + $0x60] sm:$0xff]  ;;  %v340_v14 = vld [vmem:[#allocation5 + $0x58] sm:$0xff]  ;;  %v358_v16 = vld [vmem:[#allocation5 + $0xd0] sm:$0xff]  ;;  %p1357_p1 = scmp.ne.s32.totalorder %s1355_s6, %s1356_s21  ;;  %p1361_p8 = scmp.lt.s32.totalorder %s1355_s6, %s1772_s5 }
  0x33   : > { %366 = vmatpush.msra.mxu0 %v361_v7  ;;  %v339_v17 = vld [vmem:[#allocation5 + $0x50] sm:$0xff]  ;;  %v632_v18 = vld [vmem:[#allocation5 + $0x148] sm:$0xff]  ;;  %v631_v21 = vld [vmem:[#allocation5 + $0x140] sm:$0xff]  ;;  %p1362_p12 = scmp.lt.s32.totalorder %s1360_s1, %s1356_s21 }
  0x34   : > { %479 = vmatpush.msra.mxu1 %v342_v8  ;;  %642 = vmatpush.msra.mxu2 %v635_v9  ;;  %v357_v19 = vld [vmem:[#allocation5 + $0xc8] sm:$0xff]  ;;  %v356_v22 = vld [vmem:[#allocation5 + $0xc0] sm:$0xff]  ;;  %v630_v24 = vld [vmem:[#allocation5 + $0x138] sm:$0xff]  ;;  %p1358_p2 = pnand %p1357_p1, %p1549_p7 }
  0x35   : > { %367 = vmatpush.msra.mxu0 %v360_v10  ;;  %v338_v20 = vld [vmem:[#allocation5 + $0x48] sm:$0xff]  ;;  %v337_v23 = vld [vmem:[#allocation5 + $0x40] sm:$0xff]  ;;  %v355_v25 = vld [vmem:[#allocation5 + $0xb8] sm:$0xff]  ;;  %p1363_p13 = por %p1362_p12, %p1361_p8 }
  0x36   : > { %480 = vmatpush.msra.mxu1 %v341_v11  ;;  %643 = vmatpush.msra.mxu2 %v634_v12  ;;  %v336_v26 = vld [vmem:[#allocation5 + $0x38] sm:$0xff]  ;;  %v629_v27 = vld [vmem:[#allocation5 + $0x130] sm:$0xff]  ;;  %v628_v30 = vld [vmem:[#allocation5 + $0x128] sm:$0xff]  ;;  %p1359_p4 = pneg %p1358_p2 }
  0x37   : > { %368 = vmatpush.msra.mxu0 %v359_v13  ;;  %v354_v28 = vld [vmem:[#allocation5 + $0xb0] sm:$0xff]  ;;  %v353_v31 = vld [vmem:[#allocation5 + $0xa8] sm:$0xff]  ;;  %v627_v33 = vld [vmem:[#allocation5 + $0x120] sm:$0xff] }
  0x38   : > { %481 = vmatpush.msra.mxu1 %v340_v14  ;;  %644 = vmatpush.msra.mxu2 %v633_v15  ;;  %v335_v29 = vld [vmem:[#allocation5 + $0x30] sm:$0xff]  ;;  %v334_v32 = vld [vmem:[#allocation5 + $0x28] sm:$0xff]  ;;  %v352_v34 = vld [vmem:[#allocation5 + $0xa0] sm:$0xff]  ;;  %p1364_p0 = pnand %p1363_p13, %p1359_p4 }
  0x39   : > { %369 = vmatpush.msra.mxu0 %v358_v16  ;;  %v333_v35 = vld [vmem:[#allocation5 + $0x20] sm:$0xff]  ;;  %v626_v36 = vld [vmem:[#allocation5 + $0x118] sm:$0xff]  ;;  %v625_v39 = vld [vmem:[#allocation5 + $0x110] sm:$0xff] }
  0x3a   : > { %482 = vmatpush.msra.mxu1 %v339_v17  ;;  %645 = vmatpush.msra.mxu2 %v632_v18  ;;  %v351_v37 = vld [vmem:[#allocation5 + $0x98] sm:$0xff]  ;;  %v350_v40 = vld [vmem:[#allocation5 + $0x90] sm:$0xff]  ;;  %v624_v42 = vld [vmem:[#allocation5 + $0x108] sm:$0xff] }
  0x3b   : > { %370 = vmatpush.msra.mxu0 %v357_v19  ;;  %v332_v38 = vld [vmem:[#allocation5 + $0x18] sm:$0xff]  ;;  %v331_v41 = vld [vmem:[#allocation5 + $0x10] sm:$0xff]  ;;  %v349_v43 = vld [vmem:[#allocation5 + $0x88] sm:$0xff] }
  0x3c   : > { %483 = vmatpush.msra.mxu1 %v338_v20  ;;  %646 = vmatpush.msra.mxu2 %v631_v21  ;;  %v330_v44 = vld [vmem:[#allocation5 + $0x8] sm:$0xff]  ;;  %v623_v45 = vld [vmem:[#allocation5 + $0x100] sm:$0xff]  ;;  %v299_v49 = vld [vmem:[%s1573_s11 + $0x10] sm:$0xff] }
  0x3d   : > { %371 = vmatpush.msra.mxu0 %v356_v22  ;;  %v348_v46 = vld [vmem:[#allocation5 + $0x80] sm:$0xff]  ;;  %v591_v51 = vld [vmem:[%s1573_s11 + $0x28] sm:$0xff]  ;;  %v300_v52 = vld [vmem:[%s1573_s11 + $0x18] sm:$0xff] }
  0x3e   : > { %484 = vmatpush.msra.mxu1 %v337_v23  ;;  %647 = vmatpush.msra.mxu2 %v630_v24  ;;  %v590_v47 = vld [vmem:[%s1573_s11 + $0x20] sm:$0xff]  ;;  %v298_v53 = vld [vmem:[%s1573_s11 + $0x8] sm:$0xff]  ;;  %v592_v54 = vld [vmem:[%s1573_s11 + $0x30] sm:$0xff] }
  0x3f   : > { %372 = vmatpush.msra.mxu0 %v355_v25  ;;  %v329_v48 = vld [vmem:[#allocation5] sm:$0xff]  ;;  %v593_v55 = vld [vmem:[%s1573_s11 + $0x38] sm:$0xff]  ;;  %v595_v57 = vld [vmem:[%s1573_s11 + $0x48] sm:$0xff] }
  0x40   : > { %485 = vmatpush.msra.mxu1 %v336_v26  ;;  %648 = vmatpush.msra.mxu2 %v629_v27  ;;  %v297_v50 = vld [vmem:[%s1573_s11] sm:$0xff]  ;;  %v596_v58 = vld [vmem:[%s1573_s11 + $0x50] sm:$0xff]  ;;  %v597_v59 = vld [vmem:[%s1573_s11 + $0x58] sm:$0xff] }
  0x41   : > { %373 = vmatpush.msra.mxu0 %v354_v28  ;;  %v594_v56 = vld [vmem:[%s1573_s11 + $0x40] sm:$0xff]  ;;  %v599_v61 = vld [vmem:[%s1573_s11 + $0x68] sm:$0xff]  ;;  %v867_v62 = vld [vmem:[#allocation7 + $0x78] sm:$0xff] }
  0x42   : > { %486 = vmatpush.msra.mxu1 %v335_v29  ;;  %649 = vmatpush.msra.mxu2 %v628_v30  ;;  %v598_v60 = vld [vmem:[%s1573_s11 + $0x60] sm:$0xff]  ;;  %v866_v63 = vld [vmem:[#allocation7 + $0x70] sm:$0xff]  ;;  %v865_v0 = vld [vmem:[#allocation7 + $0x68] sm:$0xff] }
  0x43   : > { %374 = vmatpush.msra.mxu0 %v353_v31  ;;  %872 = vmatpush.msra.mxu3 %v867_v62  ;;  %v600_v1 = vld [vmem:[%s1573_s11 + $0x70] sm:$0xff]  ;;  %v864_v2 = vld [vmem:[#allocation7 + $0x60] sm:$0xff]  ;;  %v863_v3 = vld [vmem:[#allocation7 + $0x58] sm:$0xff] }
  0x44   : > { %487 = vmatpush.msra.mxu1 %v334_v32  ;;  %650 = vmatpush.msra.mxu2 %v627_v33  ;;  %v862_v4 = vld [vmem:[#allocation7 + $0x50] sm:$0xff]  ;;  %v601_v5 = vld [vmem:[%s1573_s11 + $0x78] sm:$0xff]  ;;  %v861_v6 = vld [vmem:[#allocation7 + $0x48] sm:$0xff] }
  0x45   : > { %375 = vmatpush.msra.mxu0 %v352_v34  ;;  %873 = vmatpush.msra.mxu3 %v866_v63  ;;  %v860_v7 = vld [vmem:[#allocation7 + $0x40] sm:$0xff]  ;;  %v859_v8 = vld [vmem:[#allocation7 + $0x38] sm:$0xff]  ;;  %v858_v9 = vld [vmem:[#allocation7 + $0x30] sm:$0xff] }
  0x46   : > { %488 = vmatpush.msra.mxu1 %v333_v35  ;;  %651 = vmatpush.msra.mxu2 %v626_v36  ;;  %v602_v10 = vld [vmem:[%s1573_s11 + $0x80] sm:$0xff]  ;;  %v857_v11 = vld [vmem:[#allocation7 + $0x28] sm:$0xff]  ;;  %v855_v13 = vld [vmem:[#allocation7 + $0x18] sm:$0xff] }
  0x47   : > { %376 = vmatpush.msra.mxu0 %v351_v37  ;;  %874 = vmatpush.msra.mxu3 %v865_v0  ;;  %v856_v12 = vld [vmem:[#allocation7 + $0x20] sm:$0xff]  ;;  %v854_v14 = vld [vmem:[#allocation7 + $0x10] sm:$0xff]  ;;  %v603_v15 = vld [vmem:[%s1573_s11 + $0x88] sm:$0xff] }
  0x48   : > { %489 = vmatpush.msra.mxu1 %v332_v38  ;;  %652 = vmatpush.msra.mxu2 %v625_v39  ;;  %v853_v16 = vld [vmem:[#allocation7 + $0x8] sm:$0xff]  ;;  %v852_v17 = vld [vmem:[#allocation7] sm:$0xff]  ;;  %v604_v18 = vld [vmem:[%s1573_s11 + $0x90] sm:$0xff] }
  0x49   : > { %377 = vmatpush.msra.mxu0 %v350_v40  ;;  %875 = vmatpush.msra.mxu3 %v864_v2  ;;  %v605_v19 = vld [vmem:[%s1573_s11 + $0x98] sm:$0xff]  ;;  %v606_v20 = vld [vmem:[%s1573_s11 + $0xa0] sm:$0xff]  ;;  %v607_v27 = vld [vmem:[%s1573_s11 + $0xa8] sm:$0xff] }
  0x4a   : > { %490 = vmatpush.msra.mxu1 %v331_v41  ;;  %653 = vmatpush.msra.mxu2 %v624_v42  ;;  %v1607_v24 = vld [vmem:[%s1769_s2] ss:$0 sm:$0xff]  ;;  %v608_v35 = vld [vmem:[%s1573_s11 + $0xb0] sm:$0xff] }
  0x4b   : > { %378 = vmatpush.msra.mxu0 %v349_v43  ;;  %876 = vmatpush.msra.mxu3 %v863_v3  ;;  %v609_v43 = vld [vmem:[%s1573_s11 + $0xb8] sm:$0xff]  ;;  %v612_v3 = vld [vmem:[%s1573_s11 + $0xd0] sm:$0xff] }
  0x4c   : > { %491 = vmatpush.msra.mxu1 %v330_v44  ;;  %654 = vmatpush.msra.mxu2 %v623_v45 }
  0x4d   : > { %379 = vmatpush.msra.mxu0 %v348_v46  ;;  %655 = vmatmul.f32.vlgmr.msra.gmra.mxu2 %v590_v47 }
  0x4e   : > { %492 = vmatpush.msra.mxu1 %v329_v48  ;;  %380 = vmatmul.f32.vlgmr.msra.gmra.mxu0 %v299_v49 }
  0x4f   : > { %493 = vmatmul.f32.vlgmr.msra.gmra.mxu1 %v297_v50  ;;  %877 = vmatpush.msra.mxu3 %v862_v4 }
  0x51   : > { %878 = vmatpush.msra.mxu3 %v861_v6 }
  0x53   : > { %879 = vmatpush.msra.mxu3 %v860_v7 }
  0x55   : > { %658 = vmatmul.f32.gmra.mxu2 %v591_v51  ;;  %880 = vmatpush.msra.mxu3 %v859_v8 }
  0x56   : > { %383 = vmatmul.f32.gmra.mxu0 %v300_v52 }
  0x57   : > { %496 = vmatmul.f32.gmra.mxu1 %v298_v53  ;;  %881 = vmatpush.msra.mxu3 %v858_v9 }
  0x59   : > { %882 = vmatpush.msra.mxu3 %v857_v11  ;;  %v613_v11 = vld [vmem:[%s1573_s11 + $0xd8] sm:$0xff] }
  0x5b   : > { %883 = vmatpush.msra.mxu3 %v856_v12 }
  0x5d   : > { %661 = vmatmul.f32.gmra.mxu2 %v592_v54  ;;  %884 = vmatpush.msra.mxu3 %v855_v13 }
  0x5e   : > { %386 = vmatmul.f32.gmra.mxu0 %v590_v47 }
  0x5f   : > { %499 = vmatmul.f32.gmra.mxu1 %v299_v49  ;;  %885 = vmatpush.msra.mxu3 %v854_v14 }
  0x61   : > { %886 = vmatpush.msra.mxu3 %v853_v16 }
  0x63   : > { %887 = vmatpush.msra.mxu3 %v852_v17 }
  0x65   : > { %664 = vmatmul.f32.gmra.mxu2 %v593_v55 }
  0x66   : > { %389 = vmatmul.f32.gmra.mxu0 %v591_v51 }
  0x67   : > { %502 = vmatmul.f32.gmra.mxu1 %v300_v52 }
  0x6d   : > { %667 = vmatmul.f32.gmra.mxu2 %v594_v56 }
  0x6e   : > { %392 = vmatmul.f32.gmra.mxu0 %v592_v54 }
  0x6f   : > { %505 = vmatmul.f32.gmra.mxu1 %v590_v47 }
  0x75   : > { %670 = vmatmul.f32.gmra.mxu2 %v595_v57 }
  0x76   : > { %395 = vmatmul.f32.gmra.mxu0 %v593_v55 }
  0x77   : > { %508 = vmatmul.f32.gmra.mxu1 %v591_v51  ;;  %v610_v51 = vld [vmem:[%s1573_s11 + $0xc0] sm:$0xff] }
  0x7d   : > { %673 = vmatmul.f32.gmra.mxu2 %v596_v58 }
  0x7e   : > { %398 = vmatmul.f32.gmra.mxu0 %v594_v56 }
  0x7f   : > { %511 = vmatmul.f32.gmra.mxu1 %v592_v54 }
  0x85   : > { %676 = vmatmul.f32.gmra.mxu2 %v597_v59 }
  0x86   : > { %401 = vmatmul.f32.gmra.mxu0 %v595_v57 }
  0x87   : > { %514 = vmatmul.f32.gmra.mxu1 %v593_v55 }
  0x8d   : > { %679 = vmatmul.f32.gmra.mxu2 %v598_v60 }
  0x8e   : > { %404 = vmatmul.f32.gmra.mxu0 %v596_v58 }
  0x8f   : > { %517 = vmatmul.f32.gmra.mxu1 %v594_v56 }
  0x95   : > { %682 = vmatmul.f32.gmra.mxu2 %v599_v61 }
  0x96   : > { %407 = vmatmul.f32.gmra.mxu0 %v597_v59 }
  0x97   : > { %520 = vmatmul.f32.gmra.mxu1 %v595_v57 }
  0x9d   : > { %685 = vmatmul.f32.gmra.mxu2 %v600_v1 }
  0x9e   : > { %410 = vmatmul.f32.gmra.mxu0 %v598_v60 }
  0x9f   : > { %523 = vmatmul.f32.gmra.mxu1 %v596_v58 }
  0xa5   : > { %688 = vmatmul.f32.gmra.mxu2 %v601_v5 }
  0xa6   : > { %413 = vmatmul.f32.gmra.mxu0 %v599_v61 }
  0xa7   : > { %526 = vmatmul.f32.gmra.mxu1 %v597_v59  ;;  %v611_v59 = vld [vmem:[%s1573_s11 + $0xc8] sm:$0xff] }
  0xad   : > { %691 = vmatmul.f32.gmra.mxu2 %v602_v10 }
  0xae   : > { %416 = vmatmul.f32.gmra.mxu0 %v600_v1 }
  0xaf   : > { %529 = vmatmul.f32.gmra.mxu1 %v598_v60 }
  0xb5   : > { %694 = vmatmul.f32.gmra.mxu2 %v603_v15 }
  0xb6   : > { %419 = vmatmul.f32.gmra.mxu0 %v601_v5 }
  0xb7   : > { %532 = vmatmul.f32.gmra.mxu1 %v599_v61 }
  0xbd   : > { %697 = vmatmul.f32.gmra.mxu2 %v604_v18 }
  0xbe   : > { %422 = vmatmul.f32.gmra.mxu0 %v602_v10 }
  0xbf   : > { %535 = vmatmul.f32.gmra.mxu1 %v600_v1 }
  0xc5   : > { %700 = vmatmul.f32.gmra.mxu2 %v605_v19 }
  0xc6   : > { %425 = vmatmul.f32.gmra.mxu0 %v603_v15 }
  0xc7   : > { %538 = vmatmul.f32.gmra.mxu1 %v601_v5 }
  0xcb   : > { %v381_v21 = vpop.f32.mrf.mxu0 }
  0xcc   : > { %v494_v22 = vpop.f32.mrf.mxu1 }
  0xcd   : > { %703 = vmatmul.f32.gmra.mxu2 %v606_v20  ;;  %v495_v23 = vadd.f32 %v494_v22, %v381_v21 }
  0xce   : > { %428 = vmatmul.f32.gmra.mxu0 %v604_v18 }
  0xcf   : > { %541 = vmatmul.f32.gmra.mxu1 %v602_v10 }
  0xd0   : > { %v656_v25 = vpop.f32.mrf.mxu2 }
  0xd1   : > { %v752_v26 = vadd.f32 %v656_v25, %v495_v23 }
  0xd3   : > { %v384_v28 = vpop.f32.mrf.mxu0  ;;  %v788_v30 = vadd.f32 %v1607_v24, %v752_v26 }
  0xd4   : > { %v497_v29 = vpop.f32.mrf.mxu1 }
  0xd5   : > { %706 = vmatmul.f32.gmra.mxu2 %v607_v27  ;;  %v498_v31 = vadd.f32 %v497_v29, %v384_v28  ;;  %v820_v32 = vmax.f32 %v788_v30, 0.0  ;;  %v615_v28 = vld [vmem:[%s1573_s11 + $0xe8] sm:$0xff] }
  0xd6   : > { %431 = vmatmul.f32.gmra.mxu0 %v605_v19 }
  0xd7   : > { %544 = vmatmul.f32.gmra.mxu1 %v603_v15  ;;  %888 = vmatmul.f32.vlgmr.msra.gmra.mxu3 %v820_v32 }
  0xd8   : > { %v659_v33 = vpop.f32.mrf.mxu2 }
  0xd9   : > { %v753_v34 = vadd.f32 %v659_v33, %v498_v31 }
  0xdb   : > { %v387_v36 = vpop.f32.mrf.mxu0  ;;  %v789_v38 = vadd.f32 %v1607_v24, %v753_v34 }
  0xdc   : > { %v500_v37 = vpop.f32.mrf.mxu1 }
  0xdd   : > { %709 = vmatmul.f32.gmra.mxu2 %v608_v35  ;;  %v501_v39 = vadd.f32 %v500_v37, %v387_v36  ;;  %v821_v40 = vmax.f32 %v789_v38, 0.0  ;;  %v616_v36 = vld [vmem:[%s1573_s11 + $0xf0] sm:$0xff] }
  0xde   : > { %434 = vmatmul.f32.gmra.mxu0 %v606_v20 }
  0xdf   : > { %547 = vmatmul.f32.gmra.mxu1 %v604_v18  ;;  %891 = vmatmul.f32.gmra.mxu3 %v821_v40 }
  0xe0   : > { %v662_v41 = vpop.f32.mrf.mxu2 }
  0xe1   : > { %v754_v42 = vadd.f32 %v662_v41, %v501_v39 }
  0xe3   : > { %v390_v44 = vpop.f32.mrf.mxu0  ;;  %v790_v46 = vadd.f32 %v1607_v24, %v754_v42 }
  0xe4   : > { %v503_v45 = vpop.f32.mrf.mxu1 }
  0xe5   : > { %712 = vmatmul.f32.gmra.mxu2 %v609_v43  ;;  %v504_v47 = vadd.f32 %v503_v45, %v390_v44  ;;  %v822_v48 = vmax.f32 %v790_v46, 0.0  ;;  %v617_v44 = vld [vmem:[%s1573_s11 + $0xf8] sm:$0xff] }
  0xe6   : > { %437 = vmatmul.f32.gmra.mxu0 %v607_v27 }
  0xe7   : > { %550 = vmatmul.f32.gmra.mxu1 %v605_v19  ;;  %894 = vmatmul.f32.gmra.mxu3 %v822_v48  ;;  %v614_v19 = vld [vmem:[%s1573_s11 + $0xe0] sm:$0xff] }
  0xe8   : > { %v665_v49 = vpop.f32.mrf.mxu2 }
  0xe9   : > { %v755_v50 = vadd.f32 %v665_v49, %v504_v47 }
  0xeb   : > { %v393_v52 = vpop.f32.mrf.mxu0  ;;  %v791_v54 = vadd.f32 %v1607_v24, %v755_v50 }
  0xec   : > { %v506_v53 = vpop.f32.mrf.mxu1 }
  0xed   : > { %715 = vmatmul.f32.gmra.mxu2 %v610_v51  ;;  %v507_v55 = vadd.f32 %v506_v53, %v393_v52  ;;  %v823_v56 = vmax.f32 %v791_v54, 0.0  ;;  %v618_v52 = vld [vmem:[%s1573_s11 + $0x100] sm:$0xff] }
  0xee   : > { %440 = vmatmul.f32.gmra.mxu0 %v608_v35 }
  0xef   : > { %553 = vmatmul.f32.gmra.mxu1 %v606_v20  ;;  %897 = vmatmul.f32.gmra.mxu3 %v823_v56 }
  0xf0   : > { %v668_v57 = vpop.f32.mrf.mxu2 }
  0xf1   : > { %v756_v58 = vadd.f32 %v668_v57, %v507_v55 }
  0xf3   : > { %v396_v60 = vpop.f32.mrf.mxu0  ;;  %v792_v62 = vadd.f32 %v1607_v24, %v756_v58 }
  0xf4   : > { %v509_v61 = vpop.f32.mrf.mxu1 }
  0xf5   : > { %718 = vmatmul.f32.gmra.mxu2 %v611_v59  ;;  %v510_v63 = vadd.f32 %v509_v61, %v396_v60  ;;  %v824_v0 = vmax.f32 %v792_v62, 0.0  ;;  %v619_v60 = vld [vmem:[%s1573_s11 + $0x108] sm:$0xff] }
  0xf6   : > { %443 = vmatmul.f32.gmra.mxu0 %v609_v43 }
  0xf7   : > { %556 = vmatmul.f32.gmra.mxu1 %v607_v27  ;;  %900 = vmatmul.f32.gmra.mxu3 %v824_v0 }
  0xf8   : > { %v671_v1 = vpop.f32.mrf.mxu2 }
  0xf9   : > { %v757_v2 = vadd.f32 %v671_v1, %v510_v63 }
  0xfb   : > { %v399_v4 = vpop.f32.mrf.mxu0  ;;  %v793_v6 = vadd.f32 %v1607_v24, %v757_v2 }
  0xfc   : > { %v512_v5 = vpop.f32.mrf.mxu1 }
  0xfd   : > { %721 = vmatmul.f32.gmra.mxu2 %v612_v3  ;;  %v513_v7 = vadd.f32 %v512_v5, %v399_v4  ;;  %v825_v8 = vmax.f32 %v793_v6, 0.0  ;;  %v620_v4 = vld [vmem:[%s1573_s11 + $0x110] sm:$0xff] }
  0xfe   : > { %446 = vmatmul.f32.gmra.mxu0 %v610_v51 }
  0xff   : > { %559 = vmatmul.f32.gmra.mxu1 %v608_v35  ;;  %903 = vmatmul.f32.gmra.mxu3 %v825_v8 }
 0x100   : > { %v674_v9 = vpop.f32.mrf.mxu2 }
 0x101   : > { %v758_v10 = vadd.f32 %v674_v9, %v513_v7 }
 0x103   : > { %v402_v12 = vpop.f32.mrf.mxu0  ;;  %v794_v14 = vadd.f32 %v1607_v24, %v758_v10 }
 0x104   : > { %v515_v13 = vpop.f32.mrf.mxu1 }
 0x105   : > { %724 = vmatmul.f32.gmra.mxu2 %v613_v11  ;;  %v516_v15 = vadd.f32 %v515_v13, %v402_v12  ;;  %v826_v16 = vmax.f32 %v794_v14, 0.0  ;;  %v621_v12 = vld [vmem:[%s1573_s11 + $0x118] sm:$0xff] }
 0x106   : > { %449 = vmatmul.f32.gmra.mxu0 %v611_v59 }
 0x107   : > { %562 = vmatmul.f32.gmra.mxu1 %v609_v43  ;;  %906 = vmatmul.f32.gmra.mxu3 %v826_v16 }
 0x108   : > { %v677_v17 = vpop.f32.mrf.mxu2 }
 0x109   : > { %v759_v18 = vadd.f32 %v677_v17, %v516_v15 }
 0x10b   : > { %v405_v20 = vpop.f32.mrf.mxu0  ;;  %v795_v22 = vadd.f32 %v1607_v24, %v759_v18 }
 0x10c   : > { %v518_v21 = vpop.f32.mrf.mxu1 }
 0x10d   : > { %727 = vmatmul.f32.gmra.mxu2 %v614_v19  ;;  %v519_v23 = vadd.f32 %v518_v21, %v405_v20  ;;  %v827_v25 = vmax.f32 %v795_v22, 0.0 }
 0x10e   : > { %452 = vmatmul.f32.gmra.mxu0 %v612_v3 }
 0x10f   : > { %565 = vmatmul.f32.gmra.mxu1 %v610_v51  ;;  %909 = vmatmul.f32.gmra.mxu3 %v827_v25 }
 0x110   : > { %v680_v26 = vpop.f32.mrf.mxu2 }
 0x111   : > { %v760_v27 = vadd.f32 %v680_v26, %v519_v23 }
 0x113   : > { %v408_v29 = vpop.f32.mrf.mxu0  ;;  %v796_v31 = vadd.f32 %v1607_v24, %v760_v27 }
 0x114   : > { %v521_v30 = vpop.f32.mrf.mxu1 }
 0x115   : > { %730 = vmatmul.f32.gmra.mxu2 %v615_v28  ;;  %v522_v32 = vadd.f32 %v521_v30, %v408_v29  ;;  %v828_v33 = vmax.f32 %v796_v31, 0.0 }
 0x116   : > { %455 = vmatmul.f32.gmra.mxu0 %v613_v11 }
 0x117   : > { %568 = vmatmul.f32.gmra.mxu1 %v611_v59  ;;  %912 = vmatmul.f32.gmra.mxu3 %v828_v33  ;;  %v1645_v33 = vld [vmem:[%s1771_s4] ss:$0 sm:$0xff] }
 0x118   : > { %v683_v34 = vpop.f32.mrf.mxu2 }
 0x119   : > { %v761_v35 = vadd.f32 %v683_v34, %v522_v32 }
 0x11b   : > { %v411_v37 = vpop.f32.mrf.mxu0  ;;  %v797_v39 = vadd.f32 %v1607_v24, %v761_v35 }
 0x11c   : > { %v524_v38 = vpop.f32.mrf.mxu1 }
 0x11d   : > { %733 = vmatmul.f32.gmra.mxu2 %v616_v36  ;;  %v525_v40 = vadd.f32 %v524_v38, %v411_v37  ;;  %v829_v41 = vmax.f32 %v797_v39, 0.0 }
 0x11e   : > { %458 = vmatmul.f32.gmra.mxu0 %v614_v19 }
 0x11f   : > { %571 = vmatmul.f32.gmra.mxu1 %v612_v3  ;;  %915 = vmatmul.f32.gmra.mxu3 %v829_v41 }
 0x120   : > { %v686_v42 = vpop.f32.mrf.mxu2 }
 0x121   : > { %v762_v43 = vadd.f32 %v686_v42, %v525_v40 }
 0x123   : > { %v414_v45 = vpop.f32.mrf.mxu0  ;;  %v798_v47 = vadd.f32 %v1607_v24, %v762_v43 }
 0x124   : > { %v527_v46 = vpop.f32.mrf.mxu1 }
 0x125   : > { %736 = vmatmul.f32.gmra.mxu2 %v617_v44  ;;  %v528_v48 = vadd.f32 %v527_v46, %v414_v45  ;;  %v830_v49 = vmax.f32 %v798_v47, 0.0 }
 0x126   : > { %461 = vmatmul.f32.gmra.mxu0 %v615_v28 }
 0x127   : > { %574 = vmatmul.f32.gmra.mxu1 %v613_v11  ;;  %918 = vmatmul.f32.gmra.mxu3 %v830_v49 }
 0x128   : > { %v689_v50 = vpop.f32.mrf.mxu2 }
 0x129   : > { %v763_v51 = vadd.f32 %v689_v50, %v528_v48 }
 0x12b   : > { %v417_v53 = vpop.f32.mrf.mxu0  ;;  %v799_v55 = vadd.f32 %v1607_v24, %v763_v51 }
 0x12c   : > { %v530_v54 = vpop.f32.mrf.mxu1 }
 0x12d   : > { %739 = vmatmul.f32.gmra.mxu2 %v618_v52  ;;  %v531_v56 = vadd.f32 %v530_v54, %v417_v53  ;;  %v831_v57 = vmax.f32 %v799_v55, 0.0 }
 0x12e   : > { %464 = vmatmul.f32.gmra.mxu0 %v616_v36 }
 0x12f   : > { %577 = vmatmul.f32.gmra.mxu1 %v614_v19  ;;  %921 = vmatmul.f32.gmra.mxu3 %v831_v57 }
 0x130   : > { %v692_v58 = vpop.f32.mrf.mxu2 }
 0x131   : > { %v764_v59 = vadd.f32 %v692_v58, %v531_v56 }
 0x133   : > { %v420_v61 = vpop.f32.mrf.mxu0  ;;  %v800_v63 = vadd.f32 %v1607_v24, %v764_v59 }
 0x134   : > { %v533_v62 = vpop.f32.mrf.mxu1 }
 0x135   : > { %742 = vmatmul.f32.gmra.mxu2 %v619_v60  ;;  %v534_v0 = vadd.f32 %v533_v62, %v420_v61  ;;  %v832_v1 = vmax.f32 %v800_v63, 0.0 }
 0x136   : > { %467 = vmatmul.f32.gmra.mxu0 %v617_v44 }
 0x137   : > { %580 = vmatmul.f32.gmra.mxu1 %v615_v28  ;;  %924 = vmatmul.f32.gmra.mxu3 %v832_v1 }
 0x138   : > { %v695_v2 = vpop.f32.mrf.mxu2 }
 0x139   : > { %v765_v3 = vadd.f32 %v695_v2, %v534_v0 }
 0x13b   : > { %v423_v5 = vpop.f32.mrf.mxu0  ;;  %v801_v7 = vadd.f32 %v1607_v24, %v765_v3 }
 0x13c   : > { %v536_v6 = vpop.f32.mrf.mxu1 }
 0x13d   : > { %745 = vmatmul.f32.gmra.mxu2 %v620_v4  ;;  %v537_v8 = vadd.f32 %v536_v6, %v423_v5  ;;  %v833_v9 = vmax.f32 %v801_v7, 0.0 }
 0x13e   : > { %470 = vmatmul.f32.gmra.mxu0 %v618_v52 }
 0x13f   : > { %583 = vmatmul.f32.gmra.mxu1 %v616_v36  ;;  %927 = vmatmul.f32.gmra.mxu3 %v833_v9 }
 0x140   : > { %v698_v10 = vpop.f32.mrf.mxu2 }
 0x141   : > { %v766_v11 = vadd.f32 %v698_v10, %v537_v8 }
 0x143   : > { %v426_v13 = vpop.f32.mrf.mxu0  ;;  %v802_v15 = vadd.f32 %v1607_v24, %v766_v11 }
 0x144   : > { %v539_v14 = vpop.f32.mrf.mxu1 }
 0x145   : > { %748 = vmatmul.f32.gmra.mxu2 %v621_v12  ;;  %v540_v16 = vadd.f32 %v539_v14, %v426_v13  ;;  %v834_v17 = vmax.f32 %v802_v15, 0.0 }
 0x146   : > { %473 = vmatmul.f32.gmra.mxu0 %v619_v60 }
 0x147   : > { %586 = vmatmul.f32.gmra.mxu1 %v617_v44  ;;  %930 = vmatmul.f32.gmra.mxu3 %v834_v17 }
 0x148   : > { %v701_v18 = vpop.f32.mrf.mxu2 }
 0x149   : > { %v767_v19 = vadd.f32 %v701_v18, %v540_v16 }
 0x14b   : > { %v429_v20 = vpop.f32.mrf.mxu0  ;;  %v803_v22 = vadd.f32 %v1607_v24, %v767_v19 }
 0x14c   : > { %v542_v21 = vpop.f32.mrf.mxu1 }
 0x14d   : > { %v543_v23 = vadd.f32 %v542_v21, %v429_v20  ;;  %v835_v25 = vmax.f32 %v803_v22, 0.0 }
 0x14f   : > { %933 = vmatmul.f32.gmra.mxu3 %v835_v25 }
 0x150   : > { %v704_v26 = vpop.f32.mrf.mxu2 }
 0x151   : > { %v768_v27 = vadd.f32 %v704_v26, %v543_v23 }
 0x153   : > { %v432_v28 = vpop.f32.mrf.mxu0  ;;  %v804_v30 = vadd.f32 %v1607_v24, %v768_v27 }
 0x154   : > { %v545_v29 = vpop.f32.mrf.mxu1 }
 0x155   : > { %v546_v31 = vadd.f32 %v545_v29, %v432_v28  ;;  %v836_v32 = vmax.f32 %v804_v30, 0.0 }
 0x157   : > { %936 = vmatmul.f32.gmra.mxu3 %v836_v32 }
 0x158   : > { %v707_v34 = vpop.f32.mrf.mxu2 }
 0x159   : > { %v769_v35 = vadd.f32 %v707_v34, %v546_v31 }
 0x15a   : > { %v889_v36 = vpop.f32.mrf.mxu3 }
 0x15b   : > { %v890_v37 = vadd.f32 %v1645_v33, %v889_v36  ;;  %v435_v38 = vpop.f32.mrf.mxu0  ;;  %v805_v40 = vadd.f32 %v1607_v24, %v769_v35 }
 0x15c   : > { %v548_v39 = vpop.f32.mrf.mxu1 }
 0x15d   : > { %985 = vst [vmem:[%s1649_s14] sm:$0xff] %v890_v37  ;;  %v549_v41 = vadd.f32 %v548_v39, %v435_v38  ;;  %v837_v42 = vmax.f32 %v805_v40, 0.0 }
 0x15f   : > { %939 = vmatmul.f32.gmra.mxu3 %v837_v42 }
 0x160   : > { %v710_v43 = vpop.f32.mrf.mxu2 }
 0x161   : > { %v770_v44 = vadd.f32 %v710_v43, %v549_v41 }
 0x162   : > { %v892_v45 = vpop.f32.mrf.mxu3 }
 0x163   : > { %v893_v46 = vadd.f32 %v1645_v33, %v892_v45  ;;  %v438_v47 = vpop.f32.mrf.mxu0  ;;  %v806_v49 = vadd.f32 %v1607_v24, %v770_v44 }
 0x164   : > { %v551_v48 = vpop.f32.mrf.mxu1 }
 0x165   : > { %986 = vst [vmem:[%s1649_s14 + $0x8] sm:$0xff] %v893_v46  ;;  %v552_v50 = vadd.f32 %v551_v48, %v438_v47  ;;  %v838_v51 = vmax.f32 %v806_v49, 0.0 }
 0x167   : > { %942 = vmatmul.f32.gmra.mxu3 %v838_v51 }
 0x168   : > { %v713_v52 = vpop.f32.mrf.mxu2 }
 0x169   : > { %v771_v53 = vadd.f32 %v713_v52, %v552_v50 }
 0x16a   : > { %v895_v54 = vpop.f32.mrf.mxu3 }
 0x16b   : > { %v896_v55 = vadd.f32 %v1645_v33, %v895_v54  ;;  %v441_v56 = vpop.f32.mrf.mxu0  ;;  %v807_v58 = vadd.f32 %v1607_v24, %v771_v53 }
 0x16c   : > { %v554_v57 = vpop.f32.mrf.mxu1 }
 0x16d   : > { %987 = vst [vmem:[%s1649_s14 + $0x10] sm:$0xff] %v896_v55  ;;  %v555_v59 = vadd.f32 %v554_v57, %v441_v56  ;;  %v839_v60 = vmax.f32 %v807_v58, 0.0 }
 0x16f   : > { %945 = vmatmul.f32.gmra.mxu3 %v839_v60 }
 0x170   : > { %v716_v61 = vpop.f32.mrf.mxu2 }
 0x171   : > { %v772_v62 = vadd.f32 %v716_v61, %v555_v59 }
 0x172   : > { %v898_v63 = vpop.f32.mrf.mxu3 }
 0x173   : > { %v899_v0 = vadd.f32 %v1645_v33, %v898_v63  ;;  %v444_v1 = vpop.f32.mrf.mxu0  ;;  %v808_v3 = vadd.f32 %v1607_v24, %v772_v62 }
 0x174   : > { %v557_v2 = vpop.f32.mrf.mxu1 }
 0x175   : > { %988 = vst [vmem:[%s1649_s14 + $0x18] sm:$0xff] %v899_v0  ;;  %v558_v4 = vadd.f32 %v557_v2, %v444_v1  ;;  %v840_v5 = vmax.f32 %v808_v3, 0.0 }
 0x177   : > { %948 = vmatmul.f32.gmra.mxu3 %v840_v5 }
 0x178   : > { %v719_v6 = vpop.f32.mrf.mxu2 }
 0x179   : > { %v773_v7 = vadd.f32 %v719_v6, %v558_v4 }
 0x17a   : > { %v901_v8 = vpop.f32.mrf.mxu3 }
 0x17b   : > { %v902_v9 = vadd.f32 %v1645_v33, %v901_v8  ;;  %v447_v10 = vpop.f32.mrf.mxu0  ;;  %v809_v12 = vadd.f32 %v1607_v24, %v773_v7 }
 0x17c   : > { %v560_v11 = vpop.f32.mrf.mxu1 }
 0x17d   : > { %989 = vst [vmem:[%s1649_s14 + $0x20] sm:$0xff] %v902_v9  ;;  %v561_v13 = vadd.f32 %v560_v11, %v447_v10  ;;  %v841_v14 = vmax.f32 %v809_v12, 0.0 }
 0x17f   : > { %951 = vmatmul.f32.gmra.mxu3 %v841_v14 }
 0x180   : > { %v722_v15 = vpop.f32.mrf.mxu2 }
 0x181   : > { %v774_v16 = vadd.f32 %v722_v15, %v561_v13 }
 0x182   : > { %v904_v17 = vpop.f32.mrf.mxu3 }
 0x183   : > { %v905_v18 = vadd.f32 %v1645_v33, %v904_v17  ;;  %v450_v19 = vpop.f32.mrf.mxu0  ;;  %v810_v21 = vadd.f32 %v1607_v24, %v774_v16 }
 0x184   : > { %v563_v20 = vpop.f32.mrf.mxu1 }
 0x185   : > { %990 = vst [vmem:[%s1649_s14 + $0x28] sm:$0xff] %v905_v18  ;;  %v564_v22 = vadd.f32 %v563_v20, %v450_v19  ;;  %v842_v23 = vmax.f32 %v810_v21, 0.0 }
 0x187   : > { %954 = vmatmul.f32.gmra.mxu3 %v842_v23 }
 0x188   : > { %v725_v25 = vpop.f32.mrf.mxu2 }
 0x189   : > { %v775_v26 = vadd.f32 %v725_v25, %v564_v22 }
 0x18a   : > { %v907_v27 = vpop.f32.mrf.mxu3 }
 0x18b   : > { %v908_v28 = vadd.f32 %v1645_v33, %v907_v27  ;;  %v453_v29 = vpop.f32.mrf.mxu0  ;;  %v811_v31 = vadd.f32 %v1607_v24, %v775_v26 }
 0x18c   : > { %v566_v30 = vpop.f32.mrf.mxu1 }
 0x18d   : > { %991 = vst [vmem:[%s1649_s14 + $0x30] sm:$0xff] %v908_v28  ;;  %v567_v32 = vadd.f32 %v566_v30, %v453_v29  ;;  %v843_v34 = vmax.f32 %v811_v31, 0.0 }
 0x18f   : > { %957 = vmatmul.f32.gmra.mxu3 %v843_v34 }
 0x190   : > { %v728_v35 = vpop.f32.mrf.mxu2 }
 0x191   : > { %v776_v36 = vadd.f32 %v728_v35, %v567_v32 }
 0x192   : > { %v910_v37 = vpop.f32.mrf.mxu3 }
 0x193   : > { %v812_v38 = vadd.f32 %v1607_v24, %v776_v36  ;;  %v911_v39 = vadd.f32 %v1645_v33, %v910_v37  ;;  %v456_v40 = vpop.f32.mrf.mxu0 }
 0x194   : > { %v569_v41 = vpop.f32.mrf.mxu1 }
 0x195   : > { %v844_v42 = vmax.f32 %v812_v38, 0.0  ;;  %992 = vst [vmem:[%s1649_s14 + $0x38] sm:$0xff] %v911_v39  ;;  %v570_v43 = vadd.f32 %v569_v41, %v456_v40 }
 0x197   : > { %960 = vmatmul.f32.gmra.mxu3 %v844_v42 }
 0x198   : > { %v731_v44 = vpop.f32.mrf.mxu2 }
 0x199   : > { %v777_v45 = vadd.f32 %v731_v44, %v570_v43 }
 0x19a   : > { %v913_v46 = vpop.f32.mrf.mxu3 }
 0x19b   : > { %v813_v47 = vadd.f32 %v1607_v24, %v777_v45  ;;  %v914_v48 = vadd.f32 %v1645_v33, %v913_v46  ;;  %v459_v49 = vpop.f32.mrf.mxu0 }
 0x19c   : > { %v572_v50 = vpop.f32.mrf.mxu1 }
 0x19d   : > { %v845_v51 = vmax.f32 %v813_v47, 0.0  ;;  %993 = vst [vmem:[%s1649_s14 + $0x40] sm:$0xff] %v914_v48  ;;  %v573_v52 = vadd.f32 %v572_v50, %v459_v49 }
 0x19f   : > { %963 = vmatmul.f32.gmra.mxu3 %v845_v51 }
 0x1a0   : > { %v734_v53 = vpop.f32.mrf.mxu2 }
 0x1a1   : > { %v778_v54 = vadd.f32 %v734_v53, %v573_v52 }
 0x1a2   : > { %v916_v55 = vpop.f32.mrf.mxu3 }
 0x1a3   : > { %v814_v56 = vadd.f32 %v1607_v24, %v778_v54  ;;  %v917_v57 = vadd.f32 %v1645_v33, %v916_v55  ;;  %v462_v58 = vpop.f32.mrf.mxu0 }
 0x1a4   : > { %v575_v59 = vpop.f32.mrf.mxu1 }
 0x1a5   : > { %v846_v60 = vmax.f32 %v814_v56, 0.0  ;;  %994 = vst [vmem:[%s1649_s14 + $0x48] sm:$0xff] %v917_v57  ;;  %v576_v61 = vadd.f32 %v575_v59, %v462_v58 }
 0x1a7   : > { %966 = vmatmul.f32.gmra.mxu3 %v846_v60 }
 0x1a8   : > { %v737_v62 = vpop.f32.mrf.mxu2 }
 0x1a9   : > { %v779_v63 = vadd.f32 %v737_v62, %v576_v61 }
 0x1aa   : > { %v919_v0 = vpop.f32.mrf.mxu3 }
 0x1ab   : > { %v815_v1 = vadd.f32 %v1607_v24, %v779_v63  ;;  %v920_v2 = vadd.f32 %v1645_v33, %v919_v0  ;;  %v465_v3 = vpop.f32.mrf.mxu0 }
 0x1ac   : > { %v578_v4 = vpop.f32.mrf.mxu1 }
 0x1ad   : > { %v847_v5 = vmax.f32 %v815_v1, 0.0  ;;  %995 = vst [vmem:[%s1649_s14 + $0x50] sm:$0xff] %v920_v2  ;;  %v579_v6 = vadd.f32 %v578_v4, %v465_v3 }
 0x1af   : > { %969 = vmatmul.f32.gmra.mxu3 %v847_v5 }
 0x1b0   : > { %v740_v7 = vpop.f32.mrf.mxu2 }
 0x1b1   : > { %v780_v8 = vadd.f32 %v740_v7, %v579_v6 }
 0x1b2   : > { %v922_v9 = vpop.f32.mrf.mxu3 }
 0x1b3   : > { %v816_v10 = vadd.f32 %v1607_v24, %v780_v8  ;;  %v923_v11 = vadd.f32 %v1645_v33, %v922_v9  ;;  %v468_v12 = vpop.f32.mrf.mxu0 }
 0x1b4   : > { %v581_v13 = vpop.f32.mrf.mxu1 }
 0x1b5   : > { %v848_v14 = vmax.f32 %v816_v10, 0.0  ;;  %996 = vst [vmem:[%s1649_s14 + $0x58] sm:$0xff] %v923_v11  ;;  %v582_v15 = vadd.f32 %v581_v13, %v468_v12 }
 0x1b7   : > { %972 = vmatmul.f32.gmra.mxu3 %v848_v14 }
 0x1b8   : > { %v743_v16 = vpop.f32.mrf.mxu2 }
 0x1b9   : > { %v781_v17 = vadd.f32 %v743_v16, %v582_v15 }
 0x1ba   : > { %v925_v18 = vpop.f32.mrf.mxu3 }
 0x1bb   : > { %v817_v19 = vadd.f32 %v1607_v24, %v781_v17  ;;  %v926_v20 = vadd.f32 %v1645_v33, %v925_v18  ;;  %v471_v21 = vpop.f32.mrf.mxu0 }
 0x1bc   : > { %v584_v22 = vpop.f32.mrf.mxu1 }
 0x1bd   : > { %v849_v23 = vmax.f32 %v817_v19, 0.0  ;;  %997 = vst [vmem:[%s1649_s14 + $0x60] sm:$0xff] %v926_v20  ;;  %v585_v25 = vadd.f32 %v584_v22, %v471_v21 }
 0x1bf   : > { %975 = vmatmul.f32.gmra.mxu3 %v849_v23 }
 0x1c0   : > { %v746_v26 = vpop.f32.mrf.mxu2 }
 0x1c1   : > { %v782_v27 = vadd.f32 %v746_v26, %v585_v25 }
 0x1c2   : > { %v928_v28 = vpop.f32.mrf.mxu3 }
 0x1c3   : > { %v818_v29 = vadd.f32 %v1607_v24, %v782_v27  ;;  %v929_v30 = vadd.f32 %v1645_v33, %v928_v28  ;;  %v474_v31 = vpop.f32.mrf.mxu0 }
 0x1c4   : > { %v587_v32 = vpop.f32.mrf.mxu1 }
 0x1c5   : > { %v850_v34 = vmax.f32 %v818_v29, 0.0  ;;  %998 = vst [vmem:[%s1649_s14 + $0x68] sm:$0xff] %v929_v30  ;;  %v588_v35 = vadd.f32 %v587_v32, %v474_v31 }
 0x1c7   : > { %978 = vmatmul.f32.gmra.mxu3 %v850_v34 }
 0x1c8   : > { %v749_v36 = vpop.f32.mrf.mxu2 }
 0x1c9   : > { %v783_v37 = vadd.f32 %v749_v36, %v588_v35 }
 0x1ca   : > { %v931_v38 = vpop.f32.mrf.mxu3 }
 0x1cb   : > { %v819_v39 = vadd.f32 %v1607_v24, %v783_v37  ;;  %v932_v40 = vadd.f32 %v1645_v33, %v931_v38 }
 0x1cd   : > { %v851_v41 = vmax.f32 %v819_v39, 0.0  ;;  %999 = vst [vmem:[%s1649_s14 + $0x70] sm:$0xff] %v932_v40 }
 0x1cf   : > { %981 = vmatmul.f32.gmra.mxu3 %v851_v41 }
 0x1d2   : > { %v934_v42 = vpop.f32.mrf.mxu3 }
 0x1d3   : > { %v935_v43 = vadd.f32 %v1645_v33, %v934_v42 }
 0x1d5   : > { %1000 = vst [vmem:[%s1649_s14 + $0x78] sm:$0xff] %v935_v43 }
 0x1da   : > { %v937_v44 = vpop.f32.mrf.mxu3 }
 0x1db   : > { %v938_v45 = vadd.f32 %v1645_v33, %v937_v44 }
 0x1dd   : > { %1001 = vst [vmem:[%s1649_s14 + $0x80] sm:$0xff] %v938_v45 }
 0x1e2   : > { %v940_v46 = vpop.f32.mrf.mxu3 }
 0x1e3   : > { %v941_v24 = vadd.f32 %v1645_v33, %v940_v46 }
 0x1e5   : > { %1002 = vst [vmem:[%s1649_s14 + $0x88] sm:$0xff] %v941_v24 }
 0x1ea   : > { %v943_v47 = vpop.f32.mrf.mxu3 }
 0x1eb   : > { %v944_v48 = vadd.f32 %v1645_v33, %v943_v47 }
 0x1ed   : > { %1003 = vst [vmem:[%s1649_s14 + $0x90] sm:$0xff] %v944_v48 }
 0x1f2   : > { %v946_v49 = vpop.f32.mrf.mxu3 }
 0x1f3   : > { %v947_v50 = vadd.f32 %v1645_v33, %v946_v49 }
 0x1f5   : > { %1004 = vst [vmem:[%s1649_s14 + $0x98] sm:$0xff] %v947_v50 }
 0x1fa   : > { %v949_v51 = vpop.f32.mrf.mxu3 }
 0x1fb   : > { %v950_v52 = vadd.f32 %v1645_v33, %v949_v51 }
 0x1fd   : > { %1005 = vst [vmem:[%s1649_s14 + $0xa0] sm:$0xff] %v950_v52 }
 0x202   : > { %v952_v53 = vpop.f32.mrf.mxu3 }
 0x203   : > { %v953_v54 = vadd.f32 %v1645_v33, %v952_v53 }
 0x205   : > { %1006 = vst [vmem:[%s1649_s14 + $0xa8] sm:$0xff] %v953_v54 }
 0x20a   : > { %v955_v55 = vpop.f32.mrf.mxu3 }
 0x20b   : > { %v956_v56 = vadd.f32 %v1645_v33, %v955_v55 }
 0x20d   : > { %1007 = vst [vmem:[%s1649_s14 + $0xb0] sm:$0xff] %v956_v56 }
 0x212   : > { %v958_v57 = vpop.f32.mrf.mxu3 }
 0x213   : > { %v959_v58 = vadd.f32 %v1645_v33, %v958_v57 }
 0x215   : > { %1008 = vst [vmem:[%s1649_s14 + $0xb8] sm:$0xff] %v959_v58 }
 0x21a   : > { %v961_v59 = vpop.f32.mrf.mxu3 }
 0x21b   : > { %v962_v60 = vadd.f32 %v1645_v33, %v961_v59 }
 0x21d   : > { %1009 = vst [vmem:[%s1649_s14 + $0xc0] sm:$0xff] %v962_v60 }
 0x222   : > { %v964_v61 = vpop.f32.mrf.mxu3 }
 0x223   : > { %v965_v62 = vadd.f32 %v1645_v33, %v964_v61 }
 0x225   : > { %1010 = vst [vmem:[%s1649_s14 + $0xc8] sm:$0xff] %v965_v62 }
 0x22a   : > { %v967_v63 = vpop.f32.mrf.mxu3 }
 0x22b   : > { %v968_v0 = vadd.f32 %v1645_v33, %v967_v63 }
 0x22d   : > { %1011 = vst [vmem:[%s1649_s14 + $0xd0] sm:$0xff] %v968_v0 }
 0x232   : > { %v970_v1 = vpop.f32.mrf.mxu3 }
 0x233   : > { %v971_v2 = vadd.f32 %v1645_v33, %v970_v1 }
 0x235   : > { %1012 = vst [vmem:[%s1649_s14 + $0xd8] sm:$0xff] %v971_v2 }
 0x23a   : > { %v973_v3 = vpop.f32.mrf.mxu3 }
 0x23b   : > { %v974_v4 = vadd.f32 %v1645_v33, %v973_v3 }
 0x23d   : > { %1013 = vst [vmem:[%s1649_s14 + $0xe0] sm:$0xff] %v974_v4 }
 0x242   : > { %v976_v5 = vpop.f32.mrf.mxu3 }
 0x243   : > { %v977_v6 = vadd.f32 %v1645_v33, %v976_v5 }
 0x245   : > { %1014 = vst [vmem:[%s1649_s14 + $0xe8] sm:$0xff] %v977_v6 }
 0x24a   : > { %v979_v7 = vpop.f32.mrf.mxu3 }
 0x24b   : > { %v980_v8 = vadd.f32 %v1645_v33, %v979_v7 }
 0x24d   : > { %1015 = vst [vmem:[%s1649_s14 + $0xf0] sm:$0xff] %v980_v8 }
 0x252   : > { %v982_v9 = vpop.f32.mrf.mxu3 }
 0x253   : > { %v983_v10 = vadd.f32 %v1645_v33, %v982_v9 }
 0x255   : > { %1016 = vst [vmem:[%s1649_s14 + $0xf8] sm:$0xff] %v983_v10 }
 0x256   : > { %1367 = shalt.err (!%p1364_p0)
}
 0x257   : > { %s1432_s25 = smov 128   ;;  %s1433_s28 = smov 8  }
 0x258   : > { %1171 = dma.vmem_to_hbm [thread:$0]  (%p1549_p7), %s1033_s16, 4096, %s1035_s17, %s1018_s27, %s1432_s25, %s1432_s25, %s1433_s28  }
 0x259 PF: > { %s1049_s8 = sand.u32 1, %s1406_s18   ;;  %p1185_p3 = pnand %p1146_p11, %p1513_p6 }
 0x25a   : > { %s1050_s14 = scalar_lea.sflag [#allocation4], %s1049_s8 }
 0x25b   : > { %p1186_p5 = pneg %p1185_p3 }
 0x25d   : > { %1401 = dma.done.wait (%p1186_p5), %s1050_s14, 4096  }
 0x25e   : > { %1403 = vsyncadd (%p1186_p5), %s1050_s14, 4294963200  ;;  %s22_s23 = sadd.s32 1, %s1426_s23   ;;  %s1787_s18 = smov %s1410_s19 }
 0x25f   : > { %p19_p9 = scmp.ge.s32.totalorder %s22_s23, 4   ;;  %s1788_s19 = smov %s1414_s20 }
 0x260   : > { %s1789_s20 = smov %s1557_s10  ;;  %s1790_s21 = smov %s1422_s22 }
 0x261   : > { %s1791_s22 = smov %s1793_s24  ;;  %21 = sbr.rel (!%p19_p9) target bundleno = 10 (0xa), region = 95 }
 0x266   :  { %1056 = vsyncpa [#allocation3], 1 }
 0x267   :  { %1058 = vsyncpa [#allocation3 + $0x1], 1 }
 0x268   :  { %1059 = vsyncpa [#allocation6], 1 }
 0x269   :  { %1060 = vsyncpa [#allocation4], 1 }
 0x26a   :  { %1062 = vsyncpa [#allocation4 + $0x1], 1 }

// kernel: tpu_custom_call.1
= control target key start
LH: loop header
LB: loop body
LE: loop exit
PB: predicated region body
PF: predicated region fallthrough
CT: control target
= control target key end

     0   :  { %s1767_s0 = inlined_call_operand.hbm [shape: f32[2,1,288,128], index: 0, kind: input, shape index: {}]   ;;  %s1768_s1 = inlined_call_operand.hbm [shape: f32[3,128,128], index: 1, kind: input, shape index: {}]   ;;  %s1769_s2 = inlined_call_operand.vmem [shape: f32[1,128], index: 2, kind: input, shape index: {}]   ;;  %s1770_s3 = inlined_call_operand.hbm [shape: f32[128,128], index: 3, kind: input, shape index: {}]   ;;  %s1771_s4 = inlined_call_operand.vmem [shape: f32[1,128], index: 4, kind: input, shape index: {}]   ;;  %s1772_s5 = inlined_call_operand.hbm [shape: f32[2,256,128], index: 5, kind: output, shape index: {}]  }
   0x1   :  { %1775 = sst [smem:[#allocation12_spill]] %s1768_s1 }
   0x2   :  { %1776 = sst [smem:[#allocation13_spill]] %s1770_s3 }
   0x3   :  { %10 = vsyncpa [#allocation3], 0 }
   0x4   :  { %12 = vsyncpa [#allocation3 + $0x1], 0 }
   0x5   :  { %13 = vsyncpa [#allocation6], 0 }
   0x6   :  { %14 = vsyncpa [#allocation4], 0 }
   0x7   :  { %16 = vsyncpa [#allocation4 + $0x1], 0  ;;  %s1464_s18 = smov 0   ;;  %s1466_s19 = smov 0  }
   0x8   :  { %s1468_s20 = smov 0   ;;  %s1470_s21 = smov 0  }
   0x9   :  { %s1472_s22 = smov 0   ;;  %s1474_s23 = smov 0  }
   0xa LB: > { %s1141_s24 = sadd.s32 4294967295, %s1426_s23   ;;  %s1142_s25 = sadd.s32 4294967294, %s1426_s23   ;;  %s1426_s23 = sphi %s1474_s23, %s22_s23   ;;  %s1422_s22 = sphi %s1472_s22, %s1791_s22   ;;  %s1418_s21 = sphi %s1470_s21, %s1790_s21   ;;  %s1414_s20 = sphi %s1468_s20, %s1789_s20   ;;  %s1410_s19 = sphi %s1466_s19, %s1788_s19   ;;  %s1406_s18 = sphi %s1464_s18, %s1787_s18  }
   0xb   : > { %p56_p0 = scmp.ne.s32.totalorder %s1410_s19, %s1406_s18  ;;  %p1498_p1 = scmp.eq.s32.totalorder %s1141_s24, 0 }
   0xc   : > { %p1502_p2 = scmp.eq.s32.totalorder %s1141_s24, 1  ;;  %p172_p3 = scmp.eq.s32.totalorder %s1142_s25, 1 }
   0xd   : > { %p1508_p4 = por %p1498_p1, %p56_p0  ;;  %p1143_p5 = scmp.ge.s32.totalorder %s1426_s23, 1 }
   0xe   : > { %p1513_p6 = por %p172_p3, %p56_p0  ;;  %p179_p7 = scmp.lt.s32.totalorder %s1426_s23, 3 }
   0xf   : > { %s1781_s1 = sld [smem:[#allocation12_spill]]  ;;  %s1428_s9 = smov [#allocation5]  }
  0x10   : > { %p1521_p8 = pnand %p1143_p5, %p179_p7  ;;  %s192_s10 = sshll.u32 %s1428_s9, 4  ;;  %s193_s10 = int_to_ptr.vmem [resolvable:$true] %s192_s10 }
  0x11   : > { %p1146_p11 = scmp.ge.s32.totalorder %s1426_s23, 2  ;;  %s1783_s3 = sld [smem:[#allocation13_spill]] }
  0x12   : > { %p1173_p9 = pneg %p1521_p8  ;;  %s1773_s14 = smov 128  }
  0x13   : > { %s1774_s15 = smov 8   ;;  %s1431_s16 = smov [#allocation7]  }
  0x14   : > { %p1174_p10 = pnand %p1173_p9, %p1498_p1  ;;  %s209_s17 = sshll.u32 %s1431_s16, 4  ;;  %s210_s17 = int_to_ptr.vmem [resolvable:$true] %s209_s17 }
  0x15   : > { %s190_s7 = sshll.u32 %s1781_s1, 4  ;;  %s34_s24 = sadd.s32 1, %s1422_s22  ;;  %s191_s7 = int_to_ptr.hbm [resolvable:$true] %s190_s7 }
  0x16   : > { %1176 = dma.hbm_to_vmem [thread:$0]  (!%p1174_p10), %s191_s7, 6144, %s193_s10, [#allocation6], %s1773_s14, %s1773_s14, %s1774_s15  }
  0x17   : > { %s207_s13 = sshll.u32 %s1783_s3, 4  ;;  %s43_s25 = sadd.s32 1, %s1414_s20  ;;  %s208_s13 = int_to_ptr.hbm [resolvable:$true] %s207_s13 }
  0x18   : > { %1179 = dma.hbm_to_vmem [thread:$0]  (!%p1174_p10), %s208_s13, 2048, %s210_s17, [#allocation6], %s1773_s14, %s1773_s14, %s1774_s15  }
  0x19   : > { %p36_p12 = scmp.ge.s32.totalorder %s34_s24, 2  ;;  %p50_p13 = scmp.ne.s32.totalorder %s1414_s20, %s1410_s19 }
  0x1a   : > { %p51_p0 = scmp.eq.s32.totalorder %s1426_s23, 0  ;;  %p1190_p3 = scmp.lt.s32.totalorder %s1426_s23, 2 }
  0x1b   : > { %s1793_s24 = smov (%p36_p12, %s34_s24), 0  ;;  %p1549_p7 = por %p1502_p2, %p50_p13 }
  0x1c   : > { %p52_p5 = por %p51_p0, %p50_p13  ;;  %s38_s6 = ssub.s32 %s1422_s22, %s1793_s24 }
  0x1d   : > { %s226_s7 = sand.u32 1, %s1414_s20   ;;  %p41_p9 = scmp.eq.s32.totalorder %s38_s6, 0 }
  0x1e   : > { %s1158_s9 = smul.u32 288, %s226_s7  ;;  %p1181_p10 = pnand %p1190_p3, %p52_p5 }
  0x1f   : > { %s1557_s10 = scalar_select %p41_p9, %s1414_s20, %s43_s25  }
  0x20   : > { %s1159_s11 = smul.u32 288, %s1422_s22  ;;  %s230_s12 = scalar_lea.vmem [#allocation2], %s1158_s9 }
  0x21   : > { %s240_s13 = sshll.u32 %s230_s12, 4  ;;  %s227_s15 = scalar_lea.sflag [#allocation3], %s226_s7  ;;  %s241_s13 = int_to_ptr.vmem [resolvable:$true] %s240_s13 }
  0x22   : > { %s237_s14 = scalar_lea.hbm %s1767_s0, %s1159_s11  ;;  %s1785_s1 = smov 8  }
  0x23   : > { %s238_s27 = sshll.u32 %s237_s14, 4  ;;  %s1786_s3 = smov 128   ;;  %s239_s27 = int_to_ptr.hbm [resolvable:$true] %s238_s27 }
  0x24   : > { %1183 = dma.hbm_to_vmem [thread:$0]  (!%p1181_p10), %s239_s27, 4608, %s241_s13, %s227_s15, %s1786_s3, %s1786_s3, %s1785_s1  }
  0x25   : > { %252 = sbr.rel (%p1521_p8) target bundleno = 601 (0x259), region = 40  ;;  %s1569_s25 = sand.u32 (!%p1521_p8), 1, %s1410_s19  }
  0x26   : > { %s1160_s6 = smul.u32 (!%p1521_p8), 288, %s1569_s25  ;;  %s255_s9 = scalar_lea.sflag (!%p1521_p8), [#allocation3], %s1569_s25 }
  0x28   : > { %s1573_s11 = scalar_lea.vmem (!%p1521_p8), [#allocation2], %s1160_s6 }
  0x2a   : > { %1393 = dma.done.wait (%p1508_p4), %s255_s9, 4608  }
  0x2b   : > { %1395 = vsyncadd (%p1508_p4), %s255_s9, 4294962688 }
  0x2c   : > { %1397 = dma.done.wait (%p1498_p1), [#allocation6], 8192  }
  0x2d   : > { %1399 = vsyncadd (%p1498_p1), [#allocation6], 4294959104  ;;  %v638_v0 = vld [vmem:[#allocation5 + $0x178] sm:$0xff]  ;;  %v637_v1 = vld [vmem:[#allocation5 + $0x170] sm:$0xff]  ;;  %s1151_s26 = sshll.u32 %s1569_s25, 8  ;;  %s1157_s15 = sshll.u32 %s1418_s21, 8 }
  0x2e   : > { %v363_v2 = vld [vmem:[#allocation5 + $0xf8] sm:$0xff]  ;;  %639 = vmatpush.msra.mxu2 %v638_v0  ;;  %v362_v4 = vld [vmem:[#allocation5 + $0xf0] sm:$0xff]  ;;  %v636_v5 = vld [vmem:[#allocation5 + $0x168] sm:$0xff]  ;;  %s1649_s14 = scalar_lea.vmem [#allocation8], %s1151_s26  ;;  %s1031_s13 = scalar_lea.hbm %s1772_s5, %s1157_s15 }
  0x2f   : > { %364 = vmatpush.msra.mxu0 %v363_v2  ;;  %v344_v3 = vld [vmem:[#allocation5 + $0x78] sm:$0xff]  ;;  %v343_v6 = vld [vmem:[#allocation5 + $0x70] sm:$0xff]  ;;  %v361_v7 = vld [vmem:[#allocation5 + $0xe8] sm:$0xff]  ;;  %s1032_s16 = sshll.u32 %s1649_s14, 4  ;;  %s1034_s17 = sshll.u32 %s1031_s13, 4  ;;  %s1033_s16 = int_to_ptr.vmem [resolvable:$true] %s1032_s16  ;;  %s1035_s17 = int_to_ptr.hbm [resolvable:$true] %s1034_s17 }
  0x30   : > { %477 = vmatpush.msra.mxu1 %v344_v3  ;;  %640 = vmatpush.msra.mxu2 %v637_v1  ;;  %v342_v8 = vld [vmem:[#allocation5 + $0x68] sm:$0xff]  ;;  %v635_v9 = vld [vmem:[#allocation5 + $0x160] sm:$0xff]  ;;  %v634_v12 = vld [vmem:[#allocation5 + $0x158] sm:$0xff]  ;;  %s1018_s27 = scalar_lea.sflag [#allocation4], %s1569_s25  ;;  %s1354_s6 = sshra.s32 %s1035_s17, 4  ;;  %s1355_s6 = int_to_ptr.hbm [resolvable:$true] %s1354_s6 }
  0x31   : > { %365 = vmatpush.msra.mxu0 %v362_v4  ;;  %v360_v10 = vld [vmem:[#allocation5 + $0xe0] sm:$0xff]  ;;  %v359_v13 = vld [vmem:[#allocation5 + $0xd8] sm:$0xff]  ;;  %v633_v15 = vld [vmem:[#allocation5 + $0x150] sm:$0xff]  ;;  %s1356_s21 = scalar_lea.hbm %s1355_s6, 256  ;;  %s1360_s1 = scalar_lea.hbm %s1772_s5, 512 }
  0x32   : > { %478 = vmatpush.msra.mxu1 %v343_v6  ;;  %641 = vmatpush.msra.mxu2 %v636_v5  ;;  %v341_v11 = vld [vmem:[#allocation5 + $0x60] sm:$0xff]  ;;  %v340_v14 = vld [vmem:[#allocation5 + $0x58] sm:$0xff]  ;;  %v358_v16 = vld [vmem:[#allocation5 + $0xd0] sm:$0xff]  ;;  %p1357_p1 = scmp.ne.s32.totalorder %s1355_s6, %s1356_s21  ;;  %p1361_p8 = scmp.lt.s32.totalorder %s1355_s6, %s1772_s5 }
  0x33   : > { %366 = vmatpush.msra.mxu0 %v361_v7  ;;  %v339_v17 = vld [vmem:[#allocation5 + $0x50] sm:$0xff]  ;;  %v632_v18 = vld [vmem:[#allocation5 + $0x148] sm:$0xff]  ;;  %v631_v21 = vld [vmem:[#allocation5 + $0x140] sm:$0xff]  ;;  %p1362_p12 = scmp.lt.s32.totalorder %s1360_s1, %s1356_s21 }
  0x34   : > { %479 = vmatpush.msra.mxu1 %v342_v8  ;;  %642 = vmatpush.msra.mxu2 %v635_v9  ;;  %v357_v19 = vld [vmem:[#allocation5 + $0xc8] sm:$0xff]  ;;  %v356_v22 = vld [vmem:[#allocation5 + $0xc0] sm:$0xff]  ;;  %v630_v24 = vld [vmem:[#allocation5 + $0x138] sm:$0xff]  ;;  %p1358_p2 = pnand %p1357_p1, %p1549_p7 }
  0x35   : > { %367 = vmatpush.msra.mxu0 %v360_v10  ;;  %v338_v20 = vld [vmem:[#allocation5 + $0x48] sm:$0xff]  ;;  %v337_v23 = vld [vmem:[#allocation5 + $0x40] sm:$0xff]  ;;  %v355_v25 = vld [vmem:[#allocation5 + $0xb8] sm:$0xff]  ;;  %p1363_p13 = por %p1362_p12, %p1361_p8 }
  0x36   : > { %480 = vmatpush.msra.mxu1 %v341_v11  ;;  %643 = vmatpush.msra.mxu2 %v634_v12  ;;  %v336_v26 = vld [vmem:[#allocation5 + $0x38] sm:$0xff]  ;;  %v629_v27 = vld [vmem:[#allocation5 + $0x130] sm:$0xff]  ;;  %v628_v30 = vld [vmem:[#allocation5 + $0x128] sm:$0xff]  ;;  %p1359_p4 = pneg %p1358_p2 }
  0x37   : > { %368 = vmatpush.msra.mxu0 %v359_v13  ;;  %v354_v28 = vld [vmem:[#allocation5 + $0xb0] sm:$0xff]  ;;  %v353_v31 = vld [vmem:[#allocation5 + $0xa8] sm:$0xff]  ;;  %v627_v33 = vld [vmem:[#allocation5 + $0x120] sm:$0xff] }
  0x38   : > { %481 = vmatpush.msra.mxu1 %v340_v14  ;;  %644 = vmatpush.msra.mxu2 %v633_v15  ;;  %v335_v29 = vld [vmem:[#allocation5 + $0x30] sm:$0xff]  ;;  %v334_v32 = vld [vmem:[#allocation5 + $0x28] sm:$0xff]  ;;  %v352_v34 = vld [vmem:[#allocation5 + $0xa0] sm:$0xff]  ;;  %p1364_p0 = pnand %p1363_p13, %p1359_p4 }
  0x39   : > { %369 = vmatpush.msra.mxu0 %v358_v16  ;;  %v333_v35 = vld [vmem:[#allocation5 + $0x20] sm:$0xff]  ;;  %v626_v36 = vld [vmem:[#allocation5 + $0x118] sm:$0xff]  ;;  %v625_v39 = vld [vmem:[#allocation5 + $0x110] sm:$0xff] }
  0x3a   : > { %482 = vmatpush.msra.mxu1 %v339_v17  ;;  %645 = vmatpush.msra.mxu2 %v632_v18  ;;  %v351_v37 = vld [vmem:[#allocation5 + $0x98] sm:$0xff]  ;;  %v350_v40 = vld [vmem:[#allocation5 + $0x90] sm:$0xff]  ;;  %v624_v42 = vld [vmem:[#allocation5 + $0x108] sm:$0xff] }
  0x3b   : > { %370 = vmatpush.msra.mxu0 %v357_v19  ;;  %v332_v38 = vld [vmem:[#allocation5 + $0x18] sm:$0xff]  ;;  %v331_v41 = vld [vmem:[#allocation5 + $0x10] sm:$0xff]  ;;  %v349_v43 = vld [vmem:[#allocation5 + $0x88] sm:$0xff] }
  0x3c   : > { %483 = vmatpush.msra.mxu1 %v338_v20  ;;  %646 = vmatpush.msra.mxu2 %v631_v21  ;;  %v330_v44 = vld [vmem:[#allocation5 + $0x8] sm:$0xff]  ;;  %v623_v45 = vld [vmem:[#allocation5 + $0x100] sm:$0xff]  ;;  %v299_v49 = vld [vmem:[%s1573_s11 + $0x10] sm:$0xff] }
  0x3d   : > { %371 = vmatpush.msra.mxu0 %v356_v22  ;;  %v348_v46 = vld [vmem:[#allocation5 + $0x80] sm:$0xff]  ;;  %v591_v51 = vld [vmem:[%s1573_s11 + $0x28] sm:$0xff]  ;;  %v300_v52 = vld [vmem:[%s1573_s11 + $0x18] sm:$0xff] }
  0x3e   : > { %484 = vmatpush.msra.mxu1 %v337_v23  ;;  %647 = vmatpush.msra.mxu2 %v630_v24  ;;  %v590_v47 = vld [vmem:[%s1573_s11 + $0x20] sm:$0xff]  ;;  %v298_v53 = vld [vmem:[%s1573_s11 + $0x8] sm:$0xff]  ;;  %v592_v54 = vld [vmem:[%s1573_s11 + $0x30] sm:$0xff] }
  0x3f   : > { %372 = vmatpush.msra.mxu0 %v355_v25  ;;  %v329_v48 = vld [vmem:[#allocation5] sm:$0xff]  ;;  %v593_v55 = vld [vmem:[%s1573_s11 + $0x38] sm:$0xff]  ;;  %v595_v57 = vld [vmem:[%s1573_s11 + $0x48] sm:$0xff] }
  0x40   : > { %485 = vmatpush.msra.mxu1 %v336_v26  ;;  %648 = vmatpush.msra.mxu2 %v629_v27  ;;  %v297_v50 = vld [vmem:[%s1573_s11] sm:$0xff]  ;;  %v596_v58 = vld [vmem:[%s1573_s11 + $0x50] sm:$0xff]  ;;  %v597_v59 = vld [vmem:[%s1573_s11 + $0x58] sm:$0xff] }
  0x41   : > { %373 = vmatpush.msra.mxu0 %v354_v28  ;;  %v594_v56 = vld [vmem:[%s1573_s11 + $0x40] sm:$0xff]  ;;  %v599_v61 = vld [vmem:[%s1573_s11 + $0x68] sm:$0xff]  ;;  %v867_v62 = vld [vmem:[#allocation7 + $0x78] sm:$0xff] }
  0x42   : > { %486 = vmatpush.msra.mxu1 %v335_v29  ;;  %649 = vmatpush.msra.mxu2 %v628_v30  ;;  %v598_v60 = vld [vmem:[%s1573_s11 + $0x60] sm:$0xff]  ;;  %v866_v63 = vld [vmem:[#allocation7 + $0x70] sm:$0xff]  ;;  %v865_v0 = vld [vmem:[#allocation7 + $0x68] sm:$0xff] }
  0x43   : > { %374 = vmatpush.msra.mxu0 %v353_v31  ;;  %872 = vmatpush.msra.mxu3 %v867_v62  ;;  %v600_v1 = vld [vmem:[%s1573_s11 + $0x70] sm:$0xff]  ;;  %v864_v2 = vld [vmem:[#allocation7 + $0x60] sm:$0xff]  ;;  %v863_v3 = vld [vmem:[#allocation7 + $0x58] sm:$0xff] }
  0x44   : > { %487 = vmatpush.msra.mxu1 %v334_v32  ;;  %650 = vmatpush.msra.mxu2 %v627_v33  ;;  %v862_v4 = vld [vmem:[#allocation7 + $0x50] sm:$0xff]  ;;  %v601_v5 = vld [vmem:[%s1573_s11 + $0x78] sm:$0xff]  ;;  %v861_v6 = vld [vmem:[#allocation7 + $0x48] sm:$0xff] }
  0x45   : > { %375 = vmatpush.msra.mxu0 %v352_v34  ;;  %873 = vmatpush.msra.mxu3 %v866_v63  ;;  %v860_v7 = vld [vmem:[#allocation7 + $0x40] sm:$0xff]  ;;  %v859_v8 = vld [vmem:[#allocation7 + $0x38] sm:$0xff]  ;;  %v858_v9 = vld [vmem:[#allocation7 + $0x30] sm:$0xff] }
  0x46   : > { %488 = vmatpush.msra.mxu1 %v333_v35  ;;  %651 = vmatpush.msra.mxu2 %v626_v36  ;;  %v602_v10 = vld [vmem:[%s1573_s11 + $0x80] sm:$0xff]  ;;  %v857_v11 = vld [vmem:[#allocation7 + $0x28] sm:$0xff]  ;;  %v855_v13 = vld [vmem:[#allocation7 + $0x18] sm:$0xff] }
  0x47   : > { %376 = vmatpush.msra.mxu0 %v351_v37  ;;  %874 = vmatpush.msra.mxu3 %v865_v0  ;;  %v856_v12 = vld [vmem:[#allocation7 + $0x20] sm:$0xff]  ;;  %v854_v14 = vld [vmem:[#allocation7 + $0x10] sm:$0xff]  ;;  %v603_v15 = vld [vmem:[%s1573_s11 + $0x88] sm:$0xff] }
  0x48   : > { %489 = vmatpush.msra.mxu1 %v332_v38  ;;  %652 = vmatpush.msra.mxu2 %v625_v39  ;;  %v853_v16 = vld [vmem:[#allocation7 + $0x8] sm:$0xff]  ;;  %v852_v17 = vld [vmem:[#allocation7] sm:$0xff]  ;;  %v604_v18 = vld [vmem:[%s1573_s11 + $0x90] sm:$0xff] }
  0x49   : > { %377 = vmatpush.msra.mxu0 %v350_v40  ;;  %875 = vmatpush.msra.mxu3 %v864_v2  ;;  %v605_v19 = vld [vmem:[%s1573_s11 + $0x98] sm:$0xff]  ;;  %v606_v20 = vld [vmem:[%s1573_s11 + $0xa0] sm:$0xff]  ;;  %v607_v27 = vld [vmem:[%s1573_s11 + $0xa8] sm:$0xff] }
  0x4a   : > { %490 = vmatpush.msra.mxu1 %v331_v41  ;;  %653 = vmatpush.msra.mxu2 %v624_v42  ;;  %v1607_v24 = vld [vmem:[%s1769_s2] ss:$0 sm:$0xff]  ;;  %v608_v35 = vld [vmem:[%s1573_s11 + $0xb0] sm:$0xff] }
  0x4b   : > { %378 = vmatpush.msra.mxu0 %v349_v43  ;;  %876 = vmatpush.msra.mxu3 %v863_v3  ;;  %v609_v43 = vld [vmem:[%s1573_s11 + $0xb8] sm:$0xff]  ;;  %v612_v3 = vld [vmem:[%s1573_s11 + $0xd0] sm:$0xff] }
  0x4c   : > { %491 = vmatpush.msra.mxu1 %v330_v44  ;;  %654 = vmatpush.msra.mxu2 %v623_v45 }
  0x4d   : > { %379 = vmatpush.msra.mxu0 %v348_v46  ;;  %655 = vmatmul.f32.vlgmr.msra.gmra.mxu2 %v590_v47 }
  0x4e   : > { %492 = vmatpush.msra.mxu1 %v329_v48  ;;  %380 = vmatmul.f32.vlgmr.msra.gmra.mxu0 %v299_v49 }
  0x4f   : > { %493 = vmatmul.f32.vlgmr.msra.gmra.mxu1 %v297_v50  ;;  %877 = vmatpush.msra.mxu3 %v862_v4 }
  0x51   : > { %878 = vmatpush.msra.mxu3 %v861_v6 }
  0x53   : > { %879 = vmatpush.msra.mxu3 %v860_v7 }
  0x55   : > { %658 = vmatmul.f32.gmra.mxu2 %v591_v51  ;;  %880 = vmatpush.msra.mxu3 %v859_v8 }
  0x56   : > { %383 = vmatmul.f32.gmra.mxu0 %v300_v52 }
  0x57   : > { %496 = vmatmul.f32.gmra.mxu1 %v298_v53  ;;  %881 = vmatpush.msra.mxu3 %v858_v9 }
  0x59   : > { %882 = vmatpush.msra.mxu3 %v857_v11  ;;  %v613_v11 = vld [vmem:[%s1573_s11 + $0xd8] sm:$0xff] }
  0x5b   : > { %883 = vmatpush.msra.mxu3 %v856_v12 }
  0x5d   : > { %661 = vmatmul.f32.gmra.mxu2 %v592_v54  ;;  %884 = vmatpush.msra.mxu3 %v855_v13 }
  0x5e   : > { %386 = vmatmul.f32.gmra.mxu0 %v590_v47 }
  0x5f   : > { %499 = vmatmul.f32.gmra.mxu1 %v299_v49  ;;  %885 = vmatpush.msra.mxu3 %v854_v14 }
  0x61   : > { %886 = vmatpush.msra.mxu3 %v853_v16 }
  0x63   : > { %887 = vmatpush.msra.mxu3 %v852_v17 }
  0x65   : > { %664 = vmatmul.f32.gmra.mxu2 %v593_v55 }
  0x66   : > { %389 = vmatmul.f32.gmra.mxu0 %v591_v51 }
  0x67   : > { %502 = vmatmul.f32.gmra.mxu1 %v300_v52 }
  0x6d   : > { %667 = vmatmul.f32.gmra.mxu2 %v594_v56 }
  0x6e   : > { %392 = vmatmul.f32.gmra.mxu0 %v592_v54 }
  0x6f   : > { %505 = vmatmul.f32.gmra.mxu1 %v590_v47 }
  0x75   : > { %670 = vmatmul.f32.gmra.mxu2 %v595_v57 }
  0x76   : > { %395 = vmatmul.f32.gmra.mxu0 %v593_v55 }
  0x77   : > { %508 = vmatmul.f32.gmra.mxu1 %v591_v51  ;;  %v610_v51 = vld [vmem:[%s1573_s11 + $0xc0] sm:$0xff] }
  0x7d   : > { %673 = vmatmul.f32.gmra.mxu2 %v596_v58 }
  0x7e   : > { %398 = vmatmul.f32.gmra.mxu0 %v594_v56 }
  0x7f   : > { %511 = vmatmul.f32.gmra.mxu1 %v592_v54 }
  0x85   : > { %676 = vmatmul.f32.gmra.mxu2 %v597_v59 }
  0x86   : > { %401 = vmatmul.f32.gmra.mxu0 %v595_v57 }
  0x87   : > { %514 = vmatmul.f32.gmra.mxu1 %v593_v55 }
  0x8d   : > { %679 = vmatmul.f32.gmra.mxu2 %v598_v60 }
  0x8e   : > { %404 = vmatmul.f32.gmra.mxu0 %v596_v58 }
  0x8f   : > { %517 = vmatmul.f32.gmra.mxu1 %v594_v56 }
  0x95   : > { %682 = vmatmul.f32.gmra.mxu2 %v599_v61 }
  0x96   : > { %407 = vmatmul.f32.gmra.mxu0 %v597_v59 }
  0x97   : > { %520 = vmatmul.f32.gmra.mxu1 %v595_v57 }
  0x9d   : > { %685 = vmatmul.f32.gmra.mxu2 %v600_v1 }
  0x9e   : > { %410 = vmatmul.f32.gmra.mxu0 %v598_v60 }
  0x9f   : > { %523 = vmatmul.f32.gmra.mxu1 %v596_v58 }
  0xa5   : > { %688 = vmatmul.f32.gmra.mxu2 %v601_v5 }
  0xa6   : > { %413 = vmatmul.f32.gmra.mxu0 %v599_v61 }
  0xa7   : > { %526 = vmatmul.f32.gmra.mxu1 %v597_v59  ;;  %v611_v59 = vld [vmem:[%s1573_s11 + $0xc8] sm:$0xff] }
  0xad   : > { %691 = vmatmul.f32.gmra.mxu2 %v602_v10 }
  0xae   : > { %416 = vmatmul.f32.gmra.mxu0 %v600_v1 }
  0xaf   : > { %529 = vmatmul.f32.gmra.mxu1 %v598_v60 }
  0xb5   : > { %694 = vmatmul.f32.gmra.mxu2 %v603_v15 }
  0xb6   : > { %419 = vmatmul.f32.gmra.mxu0 %v601_v5 }
  0xb7   : > { %532 = vmatmul.f32.gmra.mxu1 %v599_v61 }
  0xbd   : > { %697 = vmatmul.f32.gmra.mxu2 %v604_v18 }
  0xbe   : > { %422 = vmatmul.f32.gmra.mxu0 %v602_v10 }
  0xbf   : > { %535 = vmatmul.f32.gmra.mxu1 %v600_v1 }
  0xc5   : > { %700 = vmatmul.f32.gmra.mxu2 %v605_v19 }
  0xc6   : > { %425 = vmatmul.f32.gmra.mxu0 %v603_v15 }
  0xc7   : > { %538 = vmatmul.f32.gmra.mxu1 %v601_v5 }
  0xcb   : > { %v381_v21 = vpop.f32.mrf.mxu0 }
  0xcc   : > { %v494_v22 = vpop.f32.mrf.mxu1 }
  0xcd   : > { %703 = vmatmul.f32.gmra.mxu2 %v606_v20  ;;  %v495_v23 = vadd.f32 %v494_v22, %v381_v21 }
  0xce   : > { %428 = vmatmul.f32.gmra.mxu0 %v604_v18 }
  0xcf   : > { %541 = vmatmul.f32.gmra.mxu1 %v602_v10 }
  0xd0   : > { %v656_v25 = vpop.f32.mrf.mxu2 }
  0xd1   : > { %v752_v26 = vadd.f32 %v656_v25, %v495_v23 }
  0xd3   : > { %v384_v28 = vpop.f32.mrf.mxu0  ;;  %v788_v30 = vadd.f32 %v1607_v24, %v752_v26 }
  0xd4   : > { %v497_v29 = vpop.f32.mrf.mxu1 }
  0xd5   : > { %706 = vmatmul.f32.gmra.mxu2 %v607_v27  ;;  %v498_v31 = vadd.f32 %v497_v29, %v384_v28  ;;  %v820_v32 = vmax.f32 %v788_v30, 0.0  ;;  %v615_v28 = vld [vmem:[%s1573_s11 + $0xe8] sm:$0xff] }
  0xd6   : > { %431 = vmatmul.f32.gmra.mxu0 %v605_v19 }
  0xd7   : > { %544 = vmatmul.f32.gmra.mxu1 %v603_v15  ;;  %888 = vmatmul.f32.vlgmr.msra.gmra.mxu3 %v820_v32 }
  0xd8   : > { %v659_v33 = vpop.f32.mrf.mxu2 }
  0xd9   : > { %v753_v34 = vadd.f32 %v659_v33, %v498_v31 }
  0xdb   : > { %v387_v36 = vpop.f32.mrf.mxu0  ;;  %v789_v38 = vadd.f32 %v1607_v24, %v753_v34 }
  0xdc   : > { %v500_v37 = vpop.f32.mrf.mxu1 }
  0xdd   : > { %709 = vmatmul.f32.gmra.mxu2 %v608_v35  ;;  %v501_v39 = vadd.f32 %v500_v37, %v387_v36  ;;  %v821_v40 = vmax.f32 %v789_v38, 0.0  ;;  %v616_v36 = vld [vmem:[%s1573_s11 + $0xf0] sm:$0xff] }
  0xde   : > { %434 = vmatmul.f32.gmra.mxu0 %v606_v20 }
  0xdf   : > { %547 = vmatmul.f32.gmra.mxu1 %v604_v18  ;;  %891 = vmatmul.f32.gmra.mxu3 %v821_v40 }
  0xe0   : > { %v662_v41 = vpop.f32.mrf.mxu2 }
  0xe1   : > { %v754_v42 = vadd.f32 %v662_v41, %v501_v39 }
  0xe3   : > { %v390_v44 = vpop.f32.mrf.mxu0  ;;  %v790_v46 = vadd.f32 %v1607_v24, %v754_v42 }
  0xe4   : > { %v503_v45 = vpop.f32.mrf.mxu1 }
  0xe5   : > { %712 = vmatmul.f32.gmra.mxu2 %v609_v43  ;;  %v504_v47 = vadd.f32 %v503_v45, %v390_v44  ;;  %v822_v48 = vmax.f32 %v790_v46, 0.0  ;;  %v617_v44 = vld [vmem:[%s1573_s11 + $0xf8] sm:$0xff] }
  0xe6   : > { %437 = vmatmul.f32.gmra.mxu0 %v607_v27 }
  0xe7   : > { %550 = vmatmul.f32.gmra.mxu1 %v605_v19  ;;  %894 = vmatmul.f32.gmra.mxu3 %v822_v48  ;;  %v614_v19 = vld [vmem:[%s1573_s11 + $0xe0] sm:$0xff] }
  0xe8   : > { %v665_v49 = vpop.f32.mrf.mxu2 }
  0xe9   : > { %v755_v50 = vadd.f32 %v665_v49, %v504_v47 }
  0xeb   : > { %v393_v52 = vpop.f32.mrf.mxu0  ;;  %v791_v54 = vadd.f32 %v1607_v24, %v755_v50 }
  0xec   : > { %v506_v53 = vpop.f32.mrf.mxu1 }
  0xed   : > { %715 = vmatmul.f32.gmra.mxu2 %v610_v51  ;;  %v507_v55 = vadd.f32 %v506_v53, %v393_v52  ;;  %v823_v56 = vmax.f32 %v791_v54, 0.0  ;;  %v618_v52 = vld [vmem:[%s1573_s11 + $0x100] sm:$0xff] }
  0xee   : > { %440 = vmatmul.f32.gmra.mxu0 %v608_v35 }
  0xef   : > { %553 = vmatmul.f32.gmra.mxu1 %v606_v20  ;;  %897 = vmatmul.f32.gmra.mxu3 %v823_v56 }
  0xf0   : > { %v668_v57 = vpop.f32.mrf.mxu2 }
  0xf1   : > { %v756_v58 = vadd.f32 %v668_v57, %v507_v55 }
  0xf3   : > { %v396_v60 = vpop.f32.mrf.mxu0  ;;  %v792_v62 = vadd.f32 %v1607_v24, %v756_v58 }
  0xf4   : > { %v509_v61 = vpop.f32.mrf.mxu1 }
  0xf5   : > { %718 = vmatmul.f32.gmra.mxu2 %v611_v59  ;;  %v510_v63 = vadd.f32 %v509_v61, %v396_v60  ;;  %v824_v0 = vmax.f32 %v792_v62, 0.0  ;;  %v619_v60 = vld [vmem:[%s1573_s11 + $0x108] sm:$0xff] }
  0xf6   : > { %443 = vmatmul.f32.gmra.mxu0 %v609_v43 }
  0xf7   : > { %556 = vmatmul.f32.gmra.mxu1 %v607_v27  ;;  %900 = vmatmul.f32.gmra.mxu3 %v824_v0 }
  0xf8   : > { %v671_v1 = vpop.f32.mrf.mxu2 }
  0xf9   : > { %v757_v2 = vadd.f32 %v671_v1, %v510_v63 }
  0xfb   : > { %v399_v4 = vpop.f32.mrf.mxu0  ;;  %v793_v6 = vadd.f32 %v1607_v24, %v757_v2 }
  0xfc   : > { %v512_v5 = vpop.f32.mrf.mxu1 }
  0xfd   : > { %721 = vmatmul.f32.gmra.mxu2 %v612_v3  ;;  %v513_v7 = vadd.f32 %v512_v5, %v399_v4  ;;  %v825_v8 = vmax.f32 %v793_v6, 0.0  ;;  %v620_v4 = vld [vmem:[%s1573_s11 + $0x110] sm:$0xff] }
  0xfe   : > { %446 = vmatmul.f32.gmra.mxu0 %v610_v51 }
  0xff   : > { %559 = vmatmul.f32.gmra.mxu1 %v608_v35  ;;  %903 = vmatmul.f32.gmra.mxu3 %v825_v8 }
 0x100   : > { %v674_v9 = vpop.f32.mrf.mxu2 }
 0x101   : > { %v758_v10 = vadd.f32 %v674_v9, %v513_v7 }
 0x103   : > { %v402_v12 = vpop.f32.mrf.mxu0  ;;  %v794_v14 = vadd.f32 %v1607_v24, %v758_v10 }
 0x104   : > { %v515_v13 = vpop.f32.mrf.mxu1 }
 0x105   : > { %724 = vmatmul.f32.gmra.mxu2 %v613_v11  ;;  %v516_v15 = vadd.f32 %v515_v13, %v402_v12  ;;  %v826_v16 = vmax.f32 %v794_v14, 0.0  ;;  %v621_v12 = vld [vmem:[%s1573_s11 + $0x118] sm:$0xff] }
 0x106   : > { %449 = vmatmul.f32.gmra.mxu0 %v611_v59 }
 0x107   : > { %562 = vmatmul.f32.gmra.mxu1 %v609_v43  ;;  %906 = vmatmul.f32.gmra.mxu3 %v826_v16 }
 0x108   : > { %v677_v17 = vpop.f32.mrf.mxu2 }
 0x109   : > { %v759_v18 = vadd.f32 %v677_v17, %v516_v15 }
 0x10b   : > { %v405_v20 = vpop.f32.mrf.mxu0  ;;  %v795_v22 = vadd.f32 %v1607_v24, %v759_v18 }
 0x10c   : > { %v518_v21 = vpop.f32.mrf.mxu1 }
 0x10d   : > { %727 = vmatmul.f32.gmra.mxu2 %v614_v19  ;;  %v519_v23 = vadd.f32 %v518_v21, %v405_v20  ;;  %v827_v25 = vmax.f32 %v795_v22, 0.0 }
 0x10e   : > { %452 = vmatmul.f32.gmra.mxu0 %v612_v3 }
 0x10f   : > { %565 = vmatmul.f32.gmra.mxu1 %v610_v51  ;;  %909 = vmatmul.f32.gmra.mxu3 %v827_v25 }
 0x110   : > { %v680_v26 = vpop.f32.mrf.mxu2 }
 0x111   : > { %v760_v27 = vadd.f32 %v680_v26, %v519_v23 }
 0x113   : > { %v408_v29 = vpop.f32.mrf.mxu0  ;;  %v796_v31 = vadd.f32 %v1607_v24, %v760_v27 }
 0x114   : > { %v521_v30 = vpop.f32.mrf.mxu1 }
 0x115   : > { %730 = vmatmul.f32.gmra.mxu2 %v615_v28  ;;  %v522_v32 = vadd.f32 %v521_v30, %v408_v29  ;;  %v828_v33 = vmax.f32 %v796_v31, 0.0 }
 0x116   : > { %455 = vmatmul.f32.gmra.mxu0 %v613_v11 }
 0x117   : > { %568 = vmatmul.f32.gmra.mxu1 %v611_v59  ;;  %912 = vmatmul.f32.gmra.mxu3 %v828_v33  ;;  %v1645_v33 = vld [vmem:[%s1771_s4] ss:$0 sm:$0xff] }
 0x118   : > { %v683_v34 = vpop.f32.mrf.mxu2 }
 0x119   : > { %v761_v35 = vadd.f32 %v683_v34, %v522_v32 }
 0x11b   : > { %v411_v37 = vpop.f32.mrf.mxu0  ;;  %v797_v39 = vadd.f32 %v1607_v24, %v761_v35 }
 0x11c   : > { %v524_v38 = vpop.f32.mrf.mxu1 }
 0x11d   : > { %733 = vmatmul.f32.gmra.mxu2 %v616_v36  ;;  %v525_v40 = vadd.f32 %v524_v38, %v411_v37  ;;  %v829_v41 = vmax.f32 %v797_v39, 0.0 }
 0x11e   : > { %458 = vmatmul.f32.gmra.mxu0 %v614_v19 }
 0x11f   : > { %571 = vmatmul.f32.gmra.mxu1 %v612_v3  ;;  %915 = vmatmul.f32.gmra.mxu3 %v829_v41 }
 0x120   : > { %v686_v42 = vpop.f32.mrf.mxu2 }
 0x121   : > { %v762_v43 = vadd.f32 %v686_v42, %v525_v40 }
 0x123   : > { %v414_v45 = vpop.f32.mrf.mxu0  ;;  %v798_v47 = vadd.f32 %v1607_v24, %v762_v43 }
 0x124   : > { %v527_v46 = vpop.f32.mrf.mxu1 }
 0x125   : > { %736 = vmatmul.f32.gmra.mxu2 %v617_v44  ;;  %v528_v48 = vadd.f32 %v527_v46, %v414_v45  ;;  %v830_v49 = vmax.f32 %v798_v47, 0.0 }
 0x126   : > { %461 = vmatmul.f32.gmra.mxu0 %v615_v28 }
 0x127   : > { %574 = vmatmul.f32.gmra.mxu1 %v613_v11  ;;  %918 = vmatmul.f32.gmra.mxu3 %v830_v49 }
 0x128   : > { %v689_v50 = vpop.f32.mrf.mxu2 }
 0x129   : > { %v763_v51 = vadd.f32 %v689_v50, %v528_v48 }
 0x12b   : > { %v417_v53 = vpop.f32.mrf.mxu0  ;;  %v799_v55 = vadd.f32 %v1607_v24, %v763_v51 }
 0x12c   : > { %v530_v54 = vpop.f32.mrf.mxu1 }
 0x12d   : > { %739 = vmatmul.f32.gmra.mxu2 %v618_v52  ;;  %v531_v56 = vadd.f32 %v530_v54, %v417_v53  ;;  %v831_v57 = vmax.f32 %v799_v55, 0.0 }
 0x12e   : > { %464 = vmatmul.f32.gmra.mxu0 %v616_v36 }
 0x12f   : > { %577 = vmatmul.f32.gmra.mxu1 %v614_v19  ;;  %921 = vmatmul.f32.gmra.mxu3 %v831_v57 }
 0x130   : > { %v692_v58 = vpop.f32.mrf.mxu2 }
 0x131   : > { %v764_v59 = vadd.f32 %v692_v58, %v531_v56 }
 0x133   : > { %v420_v61 = vpop.f32.mrf.mxu0  ;;  %v800_v63 = vadd.f32 %v1607_v24, %v764_v59 }
 0x134   : > { %v533_v62 = vpop.f32.mrf.mxu1 }
 0x135   : > { %742 = vmatmul.f32.gmra.mxu2 %v619_v60  ;;  %v534_v0 = vadd.f32 %v533_v62, %v420_v61  ;;  %v832_v1 = vmax.f32 %v800_v63, 0.0 }
 0x136   : > { %467 = vmatmul.f32.gmra.mxu0 %v617_v44 }
 0x137   : > { %580 = vmatmul.f32.gmra.mxu1 %v615_v28  ;;  %924 = vmatmul.f32.gmra.mxu3 %v832_v1 }
 0x138   : > { %v695_v2 = vpop.f32.mrf.mxu2 }
 0x139   : > { %v765_v3 = vadd.f32 %v695_v2, %v534_v0 }
 0x13b   : > { %v423_v5 = vpop.f32.mrf.mxu0  ;;  %v801_v7 = vadd.f32 %v1607_v24, %v765_v3 }
 0x13c   : > { %v536_v6 = vpop.f32.mrf.mxu1 }
 0x13d   : > { %745 = vmatmul.f32.gmra.mxu2 %v620_v4  ;;  %v537_v8 = vadd.f32 %v536_v6, %v423_v5  ;;  %v833_v9 = vmax.f32 %v801_v7, 0.0 }
 0x13e   : > { %470 = vmatmul.f32.gmra.mxu0 %v618_v52 }
 0x13f   : > { %583 = vmatmul.f32.gmra.mxu1 %v616_v36  ;;  %927 = vmatmul.f32.gmra.mxu3 %v833_v9 }
 0x140   : > { %v698_v10 = vpop.f32.mrf.mxu2 }
 0x141   : > { %v766_v11 = vadd.f32 %v698_v10, %v537_v8 }
 0x143   : > { %v426_v13 = vpop.f32.mrf.mxu0  ;;  %v802_v15 = vadd.f32 %v1607_v24, %v766_v11 }
 0x144   : > { %v539_v14 = vpop.f32.mrf.mxu1 }
 0x145   : > { %748 = vmatmul.f32.gmra.mxu2 %v621_v12  ;;  %v540_v16 = vadd.f32 %v539_v14, %v426_v13  ;;  %v834_v17 = vmax.f32 %v802_v15, 0.0 }
 0x146   : > { %473 = vmatmul.f32.gmra.mxu0 %v619_v60 }
 0x147   : > { %586 = vmatmul.f32.gmra.mxu1 %v617_v44  ;;  %930 = vmatmul.f32.gmra.mxu3 %v834_v17 }
 0x148   : > { %v701_v18 = vpop.f32.mrf.mxu2 }
 0x149   : > { %v767_v19 = vadd.f32 %v701_v18, %v540_v16 }
 0x14b   : > { %v429_v20 = vpop.f32.mrf.mxu0  ;;  %v803_v22 = vadd.f32 %v1607_v24, %v767_v19 }
 0x14c   : > { %v542_v21 = vpop.f32.mrf.mxu1 }
 0x14d   : > { %v543_v23 = vadd.f32 %v542_v21, %v429_v20  ;;  %v835_v25 = vmax.f32 %v803_v22, 0.0 }
 0x14f   : > { %933 = vmatmul.f32.gmra.mxu3 %v835_v25 }
 0x150   : > { %v704_v26 = vpop.f32.mrf.mxu2 }
 0x151   : > { %v768_v27 = vadd.f32 %v704_v26, %v543_v23 }
 0x153   : > { %v432_v28 = vpop.f32.mrf.mxu0  ;;  %v804_v30 = vadd.f32 %v1607_v24, %v768_v27 }
 0x154   : > { %v545_v29 = vpop.f32.mrf.mxu1 }
 0x155   : > { %v546_v31 = vadd.f32 %v545_v29, %v432_v28  ;;  %v836_v32 = vmax.f32 %v804_v30, 0.0 }
 0x157   : > { %936 = vmatmul.f32.gmra.mxu3 %v836_v32 }
 0x158   : > { %v707_v34 = vpop.f32.mrf.mxu2 }
 0x159   : > { %v769_v35 = vadd.f32 %v707_v34, %v546_v31 }
 0x15a   : > { %v889_v36 = vpop.f32.mrf.mxu3 }
 0x15b   : > { %v890_v37 = vadd.f32 %v1645_v33, %v889_v36  ;;  %v435_v38 = vpop.f32.mrf.mxu0  ;;  %v805_v40 = vadd.f32 %v1607_v24, %v769_v35 }
 0x15c   : > { %v548_v39 = vpop.f32.mrf.mxu1 }
 0x15d   : > { %985 = vst [vmem:[%s1649_s14] sm:$0xff] %v890_v37  ;;  %v549_v41 = vadd.f32 %v548_v39, %v435_v38  ;;  %v837_v42 = vmax.f32 %v805_v40, 0.0 }
 0x15f   : > { %939 = vmatmul.f32.gmra.mxu3 %v837_v42 }
 0x160   : > { %v710_v43 = vpop.f32.mrf.mxu2 }
 0x161   : > { %v770_v44 = vadd.f32 %v710_v43, %v549_v41 }
 0x162   : > { %v892_v45 = vpop.f32.mrf.mxu3 }
 0x163   : > { %v893_v46 = vadd.f32 %v1645_v33, %v892_v45  ;;  %v438_v47 = vpop.f32.mrf.mxu0  ;;  %v806_v49 = vadd.f32 %v1607_v24, %v770_v44 }
 0x164   : > { %v551_v48 = vpop.f32.mrf.mxu1 }
 0x165   : > { %986 = vst [vmem:[%s1649_s14 + $0x8] sm:$0xff] %v893_v46  ;;  %v552_v50 = vadd.f32 %v551_v48, %v438_v47  ;;  %v838_v51 = vmax.f32 %v806_v49, 0.0 }
 0x167   : > { %942 = vmatmul.f32.gmra.mxu3 %v838_v51 }
 0x168   : > { %v713_v52 = vpop.f32.mrf.mxu2 }
 0x169   : > { %v771_v53 = vadd.f32 %v713_v52, %v552_v50 }
 0x16a   : > { %v895_v54 = vpop.f32.mrf.mxu3 }
 0x16b   : > { %v896_v55 = vadd.f32 %v1645_v33, %v895_v54  ;;  %v441_v56 = vpop.f32.mrf.mxu0  ;;  %v807_v58 = vadd.f32 %v1607_v24, %v771_v53 }
 0x16c   : > { %v554_v57 = vpop.f32.mrf.mxu1 }
 0x16d   : > { %987 = vst [vmem:[%s1649_s14 + $0x10] sm:$0xff] %v896_v55  ;;  %v555_v59 = vadd.f32 %v554_v57, %v441_v56  ;;  %v839_v60 = vmax.f32 %v807_v58, 0.0 }
 0x16f   : > { %945 = vmatmul.f32.gmra.mxu3 %v839_v60 }
 0x170   : > { %v716_v61 = vpop.f32.mrf.mxu2 }
 0x171   : > { %v772_v62 = vadd.f32 %v716_v61, %v555_v59 }
 0x172   : > { %v898_v63 = vpop.f32.mrf.mxu3 }
 0x173   : > { %v899_v0 = vadd.f32 %v1645_v33, %v898_v63  ;;  %v444_v1 = vpop.f32.mrf.mxu0  ;;  %v808_v3 = vadd.f32 %v1607_v24, %v772_v62 }
 0x174   : > { %v557_v2 = vpop.f32.mrf.mxu1 }
 0x175   : > { %988 = vst [vmem:[%s1649_s14 + $0x18] sm:$0xff] %v899_v0  ;;  %v558_v4 = vadd.f32 %v557_v2, %v444_v1  ;;  %v840_v5 = vmax.f32 %v808_v3, 0.0 }
 0x177   : > { %948 = vmatmul.f32.gmra.mxu3 %v840_v5 }
 0x178   : > { %v719_v6 = vpop.f32.mrf.mxu2 }
 0x179   : > { %v773_v7 = vadd.f32 %v719_v6, %v558_v4 }
 0x17a   : > { %v901_v8 = vpop.f32.mrf.mxu3 }
 0x17b   : > { %v902_v9 = vadd.f32 %v1645_v33, %v901_v8  ;;  %v447_v10 = vpop.f32.mrf.mxu0  ;;  %v809_v12 = vadd.f32 %v1607_v24, %v773_v7 }
 0x17c   : > { %v560_v11 = vpop.f32.mrf.mxu1 }
 0x17d   : > { %989 = vst [vmem:[%s1649_s14 + $0x20] sm:$0xff] %v902_v9  ;;  %v561_v13 = vadd.f32 %v560_v11, %v447_v10  ;;  %v841_v14 = vmax.f32 %v809_v12, 0.0 }
 0x17f   : > { %951 = vmatmul.f32.gmra.mxu3 %v841_v14 }
 0x180   : > { %v722_v15 = vpop.f32.mrf.mxu2 }
 0x181   : > { %v774_v16 = vadd.f32 %v722_v15, %v561_v13 }
 0x182   : > { %v904_v17 = vpop.f32.mrf.mxu3 }
 0x183   : > { %v905_v18 = vadd.f32 %v1645_v33, %v904_v17  ;;  %v450_v19 = vpop.f32.mrf.mxu0  ;;  %v810_v21 = vadd.f32 %v1607_v24, %v774_v16 }
 0x184   : > { %v563_v20 = vpop.f32.mrf.mxu1 }
 0x185   : > { %990 = vst [vmem:[%s1649_s14 + $0x28] sm:$0xff] %v905_v18  ;;  %v564_v22 = vadd.f32 %v563_v20, %v450_v19  ;;  %v842_v23 = vmax.f32 %v810_v21, 0.0 }
 0x187   : > { %954 = vmatmul.f32.gmra.mxu3 %v842_v23 }
 0x188   : > { %v725_v25 = vpop.f32.mrf.mxu2 }
 0x189   : > { %v775_v26 = vadd.f32 %v725_v25, %v564_v22 }
 0x18a   : > { %v907_v27 = vpop.f32.mrf.mxu3 }
 0x18b   : > { %v908_v28 = vadd.f32 %v1645_v33, %v907_v27  ;;  %v453_v29 = vpop.f32.mrf.mxu0  ;;  %v811_v31 = vadd.f32 %v1607_v24, %v775_v26 }
 0x18c   : > { %v566_v30 = vpop.f32.mrf.mxu1 }
 0x18d   : > { %991 = vst [vmem:[%s1649_s14 + $0x30] sm:$0xff] %v908_v28  ;;  %v567_v32 = vadd.f32 %v566_v30, %v453_v29  ;;  %v843_v34 = vmax.f32 %v811_v31, 0.0 }
 0x18f   : > { %957 = vmatmul.f32.gmra.mxu3 %v843_v34 }
 0x190   : > { %v728_v35 = vpop.f32.mrf.mxu2 }
 0x191   : > { %v776_v36 = vadd.f32 %v728_v35, %v567_v32 }
 0x192   : > { %v910_v37 = vpop.f32.mrf.mxu3 }
 0x193   : > { %v812_v38 = vadd.f32 %v1607_v24, %v776_v36  ;;  %v911_v39 = vadd.f32 %v1645_v33, %v910_v37  ;;  %v456_v40 = vpop.f32.mrf.mxu0 }
 0x194   : > { %v569_v41 = vpop.f32.mrf.mxu1 }
 0x195   : > { %v844_v42 = vmax.f32 %v812_v38, 0.0  ;;  %992 = vst [vmem:[%s1649_s14 + $0x38] sm:$0xff] %v911_v39  ;;  %v570_v43 = vadd.f32 %v569_v41, %v456_v40 }
 0x197   : > { %960 = vmatmul.f32.gmra.mxu3 %v844_v42 }
 0x198   : > { %v731_v44 = vpop.f32.mrf.mxu2 }
 0x199   : > { %v777_v45 = vadd.f32 %v731_v44, %v570_v43 }
 0x19a   : > { %v913_v46 = vpop.f32.mrf.mxu3 }
 0x19b   : > { %v813_v47 = vadd.f32 %v1607_v24, %v777_v45  ;;  %v914_v48 = vadd.f32 %v1645_v33, %v913_v46  ;;  %v459_v49 = vpop.f32.mrf.mxu0 }
 0x19c   : > { %v572_v50 = vpop.f32.mrf.mxu1 }
 0x19d   : > { %v845_v51 = vmax.f32 %v813_v47, 0.0  ;;  %993 = vst [vmem:[%s1649_s14 + $0x40] sm:$0xff] %v914_v48  ;;  %v573_v52 = vadd.f32 %v572_v50, %v459_v49 }
 0x19f   : > { %963 = vmatmul.f32.gmra.mxu3 %v845_v51 }
 0x1a0   : > { %v734_v53 = vpop.f32.mrf.mxu2 }
 0x1a1   : > { %v778_v54 = vadd.f32 %v734_v53, %v573_v52 }
 0x1a2   : > { %v916_v55 = vpop.f32.mrf.mxu3 }
 0x1a3   : > { %v814_v56 = vadd.f32 %v1607_v24, %v778_v54  ;;  %v917_v57 = vadd.f32 %v1645_v33, %v916_v55  ;;  %v462_v58 = vpop.f32.mrf.mxu0 }
 0x1a4   : > { %v575_v59 = vpop.f32.mrf.mxu1 }
 0x1a5   : > { %v846_v60 = vmax.f32 %v814_v56, 0.0  ;;  %994 = vst [vmem:[%s1649_s14 + $0x48] sm:$0xff] %v917_v57  ;;  %v576_v61 = vadd.f32 %v575_v59, %v462_v58 }
 0x1a7   : > { %966 = vmatmul.f32.gmra.mxu3 %v846_v60 }
 0x1a8   : > { %v737_v62 = vpop.f32.mrf.mxu2 }
 0x1a9   : > { %v779_v63 = vadd.f32 %v737_v62, %v576_v61 }
 0x1aa   : > { %v919_v0 = vpop.f32.mrf.mxu3 }
 0x1ab   : > { %v815_v1 = vadd.f32 %v1607_v24, %v779_v63  ;;  %v920_v2 = vadd.f32 %v1645_v33, %v919_v0  ;;  %v465_v3 = vpop.f32.mrf.mxu0 }
 0x1ac   : > { %v578_v4 = vpop.f32.mrf.mxu1 }
 0x1ad   : > { %v847_v5 = vmax.f32 %v815_v1, 0.0  ;;  %995 = vst [vmem:[%s1649_s14 + $0x50] sm:$0xff] %v920_v2  ;;  %v579_v6 = vadd.f32 %v578_v4, %v465_v3 }
 0x1af   : > { %969 = vmatmul.f32.gmra.mxu3 %v847_v5 }
 0x1b0   : > { %v740_v7 = vpop.f32.mrf.mxu2 }
 0x1b1   : > { %v780_v8 = vadd.f32 %v740_v7, %v579_v6 }
 0x1b2   : > { %v922_v9 = vpop.f32.mrf.mxu3 }
 0x1b3   : > { %v816_v10 = vadd.f32 %v1607_v24, %v780_v8  ;;  %v923_v11 = vadd.f32 %v1645_v33, %v922_v9  ;;  %v468_v12 = vpop.f32.mrf.mxu0 }
 0x1b4   : > { %v581_v13 = vpop.f32.mrf.mxu1 }
 0x1b5   : > { %v848_v14 = vmax.f32 %v816_v10, 0.0  ;;  %996 = vst [vmem:[%s1649_s14 + $0x58] sm:$0xff] %v923_v11  ;;  %v582_v15 = vadd.f32 %v581_v13, %v468_v12 }
 0x1b7   : > { %972 = vmatmul.f32.gmra.mxu3 %v848_v14 }
 0x1b8   : > { %v743_v16 = vpop.f32.mrf.mxu2 }
 0x1b9   : > { %v781_v17 = vadd.f32 %v743_v16, %v582_v15 }
 0x1ba   : > { %v925_v18 = vpop.f32.mrf.mxu3 }
 0x1bb   : > { %v817_v19 = vadd.f32 %v1607_v24, %v781_v17  ;;  %v926_v20 = vadd.f32 %v1645_v33, %v925_v18  ;;  %v471_v21 = vpop.f32.mrf.mxu0 }
 0x1bc   : > { %v584_v22 = vpop.f32.mrf.mxu1 }
 0x1bd   : > { %v849_v23 = vmax.f32 %v817_v19, 0.0  ;;  %997 = vst [vmem:[%s1649_s14 + $0x60] sm:$0xff] %v926_v20  ;;  %v585_v25 = vadd.f32 %v584_v22, %v471_v21 }
 0x1bf   : > { %975 = vmatmul.f32.gmra.mxu3 %v849_v23 }
 0x1c0   : > { %v746_v26 = vpop.f32.mrf.mxu2 }
 0x1c1   : > { %v782_v27 = vadd.f32 %v746_v26, %v585_v25 }
 0x1c2   : > { %v928_v28 = vpop.f32.mrf.mxu3 }
 0x1c3   : > { %v818_v29 = vadd.f32 %v1607_v24, %v782_v27  ;;  %v929_v30 = vadd.f32 %v1645_v33, %v928_v28  ;;  %v474_v31 = vpop.f32.mrf.mxu0 }
 0x1c4   : > { %v587_v32 = vpop.f32.mrf.mxu1 }
 0x1c5   : > { %v850_v34 = vmax.f32 %v818_v29, 0.0  ;;  %998 = vst [vmem:[%s1649_s14 + $0x68] sm:$0xff] %v929_v30  ;;  %v588_v35 = vadd.f32 %v587_v32, %v474_v31 }
 0x1c7   : > { %978 = vmatmul.f32.gmra.mxu3 %v850_v34 }
 0x1c8   : > { %v749_v36 = vpop.f32.mrf.mxu2 }
 0x1c9   : > { %v783_v37 = vadd.f32 %v749_v36, %v588_v35 }
 0x1ca   : > { %v931_v38 = vpop.f32.mrf.mxu3 }
 0x1cb   : > { %v819_v39 = vadd.f32 %v1607_v24, %v783_v37  ;;  %v932_v40 = vadd.f32 %v1645_v33, %v931_v38 }
 0x1cd   : > { %v851_v41 = vmax.f32 %v819_v39, 0.0  ;;  %999 = vst [vmem:[%s1649_s14 + $0x70] sm:$0xff] %v932_v40 }
 0x1cf   : > { %981 = vmatmul.f32.gmra.mxu3 %v851_v41 }
 0x1d2   : > { %v934_v42 = vpop.f32.mrf.mxu3 }
 0x1d3   : > { %v935_v43 = vadd.f32 %v1645_v33, %v934_v42 }
 0x1d5   : > { %1000 = vst [vmem:[%s1649_s14 + $0x78] sm:$0xff] %v935_v43 }
 0x1da   : > { %v937_v44 = vpop.f32.mrf.mxu3 }
 0x1db   : > { %v938_v45 = vadd.f32 %v1645_v33, %v937_v44 }
 0x1dd   : > { %1001 = vst [vmem:[%s1649_s14 + $0x80] sm:$0xff] %v938_v45 }
 0x1e2   : > { %v940_v46 = vpop.f32.mrf.mxu3 }
 0x1e3   : > { %v941_v24 = vadd.f32 %v1645_v33, %v940_v46 }
 0x1e5   : > { %1002 = vst [vmem:[%s1649_s14 + $0x88] sm:$0xff] %v941_v24 }
 0x1ea   : > { %v943_v47 = vpop.f32.mrf.mxu3 }
 0x1eb   : > { %v944_v48 = vadd.f32 %v1645_v33, %v943_v47 }
 0x1ed   : > { %1003 = vst [vmem:[%s1649_s14 + $0x90] sm:$0xff] %v944_v48 }
 0x1f2   : > { %v946_v49 = vpop.f32.mrf.mxu3 }
 0x1f3   : > { %v947_v50 = vadd.f32 %v1645_v33, %v946_v49 }
 0x1f5   : > { %1004 = vst [vmem:[%s1649_s14 + $0x98] sm:$0xff] %v947_v50 }
 0x1fa   : > { %v949_v51 = vpop.f32.mrf.mxu3 }
 0x1fb   : > { %v950_v52 = vadd.f32 %v1645_v33, %v949_v51 }
 0x1fd   : > { %1005 = vst [vmem:[%s1649_s14 + $0xa0] sm:$0xff] %v950_v52 }
 0x202   : > { %v952_v53 = vpop.f32.mrf.mxu3 }
 0x203   : > { %v953_v54 = vadd.f32 %v1645_v33, %v952_v53 }
 0x205   : > { %1006 = vst [vmem:[%s1649_s14 + $0xa8] sm:$0xff] %v953_v54 }
 0x20a   : > { %v955_v55 = vpop.f32.mrf.mxu3 }
 0x20b   : > { %v956_v56 = vadd.f32 %v1645_v33, %v955_v55 }
 0x20d   : > { %1007 = vst [vmem:[%s1649_s14 + $0xb0] sm:$0xff] %v956_v56 }
 0x212   : > { %v958_v57 = vpop.f32.mrf.mxu3 }
 0x213   : > { %v959_v58 = vadd.f32 %v1645_v33, %v958_v57 }
 0x215   : > { %1008 = vst [vmem:[%s1649_s14 + $0xb8] sm:$0xff] %v959_v58 }
 0x21a   : > { %v961_v59 = vpop.f32.mrf.mxu3 }
 0x21b   : > { %v962_v60 = vadd.f32 %v1645_v33, %v961_v59 }
 0x21d   : > { %1009 = vst [vmem:[%s1649_s14 + $0xc0] sm:$0xff] %v962_v60 }
 0x222   : > { %v964_v61 = vpop.f32.mrf.mxu3 }
 0x223   : > { %v965_v62 = vadd.f32 %v1645_v33, %v964_v61 }
 0x225   : > { %1010 = vst [vmem:[%s1649_s14 + $0xc8] sm:$0xff] %v965_v62 }
 0x22a   : > { %v967_v63 = vpop.f32.mrf.mxu3 }
 0x22b   : > { %v968_v0 = vadd.f32 %v1645_v33, %v967_v63 }
 0x22d   : > { %1011 = vst [vmem:[%s1649_s14 + $0xd0] sm:$0xff] %v968_v0 }
 0x232   : > { %v970_v1 = vpop.f32.mrf.mxu3 }
 0x233   : > { %v971_v2 = vadd.f32 %v1645_v33, %v970_v1 }
 0x235   : > { %1012 = vst [vmem:[%s1649_s14 + $0xd8] sm:$0xff] %v971_v2 }
 0x23a   : > { %v973_v3 = vpop.f32.mrf.mxu3 }
 0x23b   : > { %v974_v4 = vadd.f32 %v1645_v33, %v973_v3 }
 0x23d   : > { %1013 = vst [vmem:[%s1649_s14 + $0xe0] sm:$0xff] %v974_v4 }
 0x242   : > { %v976_v5 = vpop.f32.mrf.mxu3 }
 0x243   : > { %v977_v6 = vadd.f32 %v1645_v33, %v976_v5 }
 0x245   : > { %1014 = vst [vmem:[%s1649_s14 + $0xe8] sm:$0xff] %v977_v6 }
 0x24a   : > { %v979_v7 = vpop.f32.mrf.mxu3 }
 0x24b   : > { %v980_v8 = vadd.f32 %v1645_v33, %v979_v7 }
 0x24d   : > { %1015 = vst [vmem:[%s1649_s14 + $0xf0] sm:$0xff] %v980_v8 }
 0x252   : > { %v982_v9 = vpop.f32.mrf.mxu3 }
 0x253   : > { %v983_v10 = vadd.f32 %v1645_v33, %v982_v9 }
 0x255   : > { %1016 = vst [vmem:[%s1649_s14 + $0xf8] sm:$0xff] %v983_v10 }
 0x256   : > { %1367 = shalt.err (!%p1364_p0)
}
 0x257   : > { %s1432_s25 = smov 128   ;;  %s1433_s28 = smov 8  }
 0x258   : > { %1171 = dma.vmem_to_hbm [thread:$0]  (%p1549_p7), %s1033_s16, 4096, %s1035_s17, %s1018_s27, %s1432_s25, %s1432_s25, %s1433_s28  }
 0x259 PF: > { %s1049_s8 = sand.u32 1, %s1406_s18   ;;  %p1185_p3 = pnand %p1146_p11, %p1513_p6 }
 0x25a   : > { %s1050_s14 = scalar_lea.sflag [#allocation4], %s1049_s8 }
 0x25b   : > { %p1186_p5 = pneg %p1185_p3 }
 0x25d   : > { %1401 = dma.done.wait (%p1186_p5), %s1050_s14, 4096  }
 0x25e   : > { %1403 = vsyncadd (%p1186_p5), %s1050_s14, 4294963200  ;;  %s22_s23 = sadd.s32 1, %s1426_s23   ;;  %s1787_s18 = smov %s1410_s19 }
 0x25f   : > { %p19_p9 = scmp.ge.s32.totalorder %s22_s23, 4   ;;  %s1788_s19 = smov %s1414_s20 }
 0x260   : > { %s1789_s20 = smov %s1557_s10  ;;  %s1790_s21 = smov %s1422_s22 }
 0x261   : > { %s1791_s22 = smov %s1793_s24  ;;  %21 = sbr.rel (!%p19_p9) target bundleno = 10 (0xa), region = 95 }
 0x266   :  { %1056 = vsyncpa [#allocation3], 1 }
 0x267   :  { %1058 = vsyncpa [#allocation3 + $0x1], 1 }
 0x268   :  { %1059 = vsyncpa [#allocation6], 1 }
 0x269   :  { %1060 = vsyncpa [#allocation4], 1 }
 0x26a   :  { %1062 = vsyncpa [#allocation4 + $0x1], 1 }

</bundles_post_ra>
